<compile_context>
chip_gen: v6e
topology: v6e:2x2x1
jax: 0.10.0
libtpu: 0.0.40
codegen_flags: <defaults>
</compile_context>

<pallas_src>
import functools

import jax
import jax.numpy as jnp
import numpy as np
from jax.experimental import pallas as pl
from jax.experimental.pallas import tpu as pltpu

LRELU = 0.2
BN_EPS = 1e-5
LANE = 128
MXU_DTYPE = jnp.bfloat16          # MXU inputs; accumulation stays f32
VMEM_LIMIT = 48 * 1024 * 1024


def _round_up(v, m):
    return (v + m - 1) // m * m


def _lrelu(x):
    return jnp.where(x > 0, x, LRELU * x)


def _sigmoid(x):
    # numerically stable, EUP-friendly form
    return 0.5 * (jnp.tanh(0.5 * x) + 1.0)


# ----------------------------- Pallas kernels ------------------------------ #

def _conv_kernel(*refs, epilogue, emit_stats):
    """matmul over one row-tile of the im2col'd conv
       -> [per-tile BatchNorm partial stats] -> [fused activation]."""
    x_ref, w_ref, o_ref = refs[0], refs[1], refs[2]
    y = jnp.dot(x_ref[...], w_ref[...], preferred_element_type=jnp.float32)

    if emit_stats:
        ssum_ref, ssq_ref = refs[3], refs[4]
        s = jnp.sum(y, axis=0, keepdims=True)           # (1, C)
        q = jnp.sum(y * y, axis=0, keepdims=True)       # (1, C)
        ssum_ref[...] = jnp.broadcast_to(s[None], ssum_ref.shape)
        ssq_ref[...] = jnp.broadcast_to(q[None], ssq_ref.shape)

    if epilogue == "lrelu":
        y = _lrelu(y)
    o_ref[...] = y.astype(o_ref.dtype)


def _bn_lrelu_kernel(scale_ref, shift_ref, x_ref, o_ref):
    """Apply finalized training-mode BatchNorm (as scale/shift) + LeakyReLU
    once per activation element (NOT on replicated patches)."""
    o_ref[...] = _lrelu(x_ref[...] * scale_ref[...] + shift_ref[...]
                        ).astype(o_ref.dtype)


def _tail_kernel(x_ref, w4_ref, g_ref, b_ref, w5_ref, o_ref, *, n, num_pos):
    """Fused tail: conv4 -> BN4 (full batch stats live in this block) -> LReLU
    -> 4x4/s1/p0 conv5 (Cout=1, done as a VPU weighted reduction) -> sigmoid."""
    y = jnp.dot(x_ref[...], w4_ref[...],
                preferred_element_type=jnp.float32)          # (n*P, C4)

    m = jnp.mean(y, axis=0, keepdims=True)
    v = jnp.maximum(jnp.mean(y * y, axis=0, keepdims=True) - m * m, 0.0)
    sc = g_ref[...] * jax.lax.rsqrt(v + BN_EPS)
    sh = b_ref[...] - m * sc
    a = _lrelu(y * sc + sh)                                  # (n*P, C4) f32

    # conv5: rows are ordered (sample, position); Cout == 1 -> weighted reduce.
    c4 = a.shape[1]
    a3 = a.reshape(n, num_pos, c4)                           # leading-dim split
    prod = a3 * w5_ref[...][None, :, :]                      # (n, P, C4)
    part = jnp.sum(prod, axis=2, keepdims=True)              # (n, P, 1)
    logit = jnp.sum(part, axis=1, keepdims=True)             # (n, 1, 1)
    o_ref[...] = _sigmoid(logit)


# ------------------------------ wrappers ------------------------------------ #

def _pick_tm(M, K, itemsize):
    """Largest power-of-two row tile that divides M, keeps the double-buffered
    patch block under ~12 MiB, and prefers >=4 grid steps (>=2 per v7x core),
    then >=2 steps, as long as the tile stays >=128 rows."""
    cap = max(8, (12 << 20) // (K * itemsize * 2))
    cands = [t for t in (2048, 1024, 512, 256, 128, 64, 32, 16, 8)
             if t <= cap and M % t == 0]
    if not cands:
        return M
    for steps in (4, 2):
        for t in cands:
            if t >= 128 and M // t >= steps:
                return t
    return cands[0]


def conv_layer(patches, w_mat, *, out_dtype, epilogue="none", emit_stats=False):
    M, K = patches.shape
    Kw, C = w_mat.shape
    assert Kw == K and K % LANE == 0 and C % LANE == 0
    tm = _pick_tm(M, K, patches.dtype.itemsize)
    gm = M // tm

    in_specs = [pl.BlockSpec((tm, K), lambda i: (i, 0)),
                pl.BlockSpec((K, C), lambda i: (0, 0))]
    out_shapes = [jax.ShapeDtypeStruct((M, C), out_dtype)]
    out_specs = [pl.BlockSpec((tm, C), lambda i: (i, 0))]
    if emit_stats:
        out_shapes += [jax.ShapeDtypeStruct((gm, 8, C), jnp.float32)] * 2
        out_specs += [pl.BlockSpec((1, 8, C), lambda i: (i, 0, 0))] * 2

    return pl.pallas_call(
        functools.partial(_conv_kernel, epilogue=epilogue,
                          emit_stats=emit_stats),
        out_shape=out_shapes,
        grid_spec=pltpu.PrefetchScalarGridSpec(
            num_scalar_prefetch=0, grid=(gm,),
            in_specs=in_specs, out_specs=out_specs),
        compiler_params=pltpu.CompilerParams(
            dimension_semantics=("parallel",),
            vmem_limit_bytes=VMEM_LIMIT),
    )(patches, w_mat)


def bn_lrelu(y, scale, shift, out_dtype):
    """Tiny per-element BN-apply + LeakyReLU pass over the (M, C) conv output."""
    M, C = y.shape
    tm = _pick_tm(M, C, y.dtype.itemsize)
    gm = M // tm
    return pl.pallas_call(
        _bn_lrelu_kernel,
        out_shape=jax.ShapeDtypeStruct((M, C), out_dtype),
        grid_spec=pltpu.PrefetchScalarGridSpec(
            num_scalar_prefetch=0, grid=(gm,),
            in_specs=[pl.BlockSpec((1, C), lambda i: (0, 0)),
                      pl.BlockSpec((1, C), lambda i: (0, 0)),
                      pl.BlockSpec((tm, C), lambda i: (i, 0))],
            out_specs=pl.BlockSpec((tm, C), lambda i: (i, 0))),
        compiler_params=pltpu.CompilerParams(
            dimension_semantics=("parallel",),
            vmem_limit_bytes=VMEM_LIMIT),
    )(scale.reshape(1, C), shift.reshape(1, C), y)


def tail_layers(patches, w4_mat, gamma4, beta4, w5_mat, n, num_pos):
    M, K = patches.shape
    C = w4_mat.shape[1]
    assert M == n * num_pos
    # NOTE: whole tail (N*16 rows) fits in one block at these sizes; tile over
    # rows with a stats/apply split (like layers 2/3) for very large N.
    return pl.pallas_call(
        functools.partial(_tail_kernel, n=n, num_pos=num_pos),
        out_shape=jax.ShapeDtypeStruct((n, 1, 1), jnp.float32),
        grid_spec=pltpu.PrefetchScalarGridSpec(
            num_scalar_prefetch=0, grid=(1,),
            in_specs=[pl.BlockSpec((M, K), lambda i: (0, 0)),
                      pl.BlockSpec((K, C), lambda i: (0, 0)),
                      pl.BlockSpec((1, C), lambda i: (0, 0)),
                      pl.BlockSpec((1, C), lambda i: (0, 0)),
                      pl.BlockSpec((num_pos, C), lambda i: (0, 0))],
            out_specs=pl.BlockSpec((n, 1, 1), lambda i: (0, 0, 0))),
        compiler_params=pltpu.CompilerParams(
            dimension_semantics=("arbitrary",),
            vmem_limit_bytes=VMEM_LIMIT),
    )(patches, w4_mat, gamma4.reshape(1, C), beta4.reshape(1, C), w5_mat)


# ------------------------------ JAX glue ----------------------------------- #

def im2col_nhwc(x, kh, kw, stride, pad):
    """x: (N,H,W,C) -> (N*Ho*Wo, kh*kw*C); column order (tap, channel).
    Plain zero spatial padding (activations are already BN+LReLU applied)."""
    N, H, W, C = x.shape
    xp = jnp.pad(x, ((0, 0), (pad, pad), (pad, pad), (0, 0))) if pad > 0 else x
    Ho = (H + 2 * pad - kh) // stride + 1
    Wo = (W + 2 * pad - kw) // stride + 1
    taps = []
    for i in range(kh):
        for j in range(kw):
            taps.append(xp[:, i:i + stride * Ho:stride,
                           j:j + stride * Wo:stride, :])
    patches = jnp.stack(taps, axis=3).reshape(N * Ho * Wo, kh * kw * C)
    return patches, Ho, Wo


def _pad_cols(a, k_pad):
    k = a.shape[1]
    return a if k == k_pad else jnp.pad(a, ((0, 0), (0, k_pad - k)))


def prep_conv_weight(w, cin_real, k_pad, cout_pad):
    """(Cout, Cin, kh, kw) -> (k_pad, cout_pad); rows ordered (tap, real channel)
    — dense K — with only the concatenated K and the output lanes zero-padded."""
    Cout, Cin, kh, kw = w.shape
    wt = jnp.transpose(w, (2, 3, 1, 0))                       # (kh, kw, Cin, Cout)
    if cin_real > Cin:                                        # layer-1 image channels only
        wt = jnp.pad(wt, ((0, 0), (0, 0), (0, cin_real - Cin), (0, 0)))
    wt = wt.reshape(kh * kw * cin_real, Cout)
    wt = jnp.pad(wt, ((0, k_pad - kh * kw * cin_real), (0, cout_pad - Cout)))
    return wt.astype(MXU_DTYPE)


def prep_final_weight(w, c_pad):
    """(1, Cin, kh, kw) -> (kh*kw, c_pad) f32 for the VPU conv5 reduction."""
    Cout, Cin, kh, kw = w.shape
    assert Cout == 1
    wt = jnp.transpose(w, (2, 3, 1, 0)).reshape(kh * kw, Cin)
    return jnp.pad(wt, ((0, 0), (0, c_pad - Cin))).astype(jnp.float32)


def _pad_gamma_beta(g, b, cpad):
    # gamma padded with 0 so padded lanes stay exactly zero after BN+LReLU.
    c = g.shape[0]
    return jnp.pad(g, (0, cpad - c)), jnp.pad(b, (0, cpad - c))


def _bn_scale_shift(ssum, ssq, count, gamma, beta):
    """Finalize training-mode BN (biased variance) from per-tile partial sums."""
    mean = ssum[:, 0, :].sum(axis=0) / count
    var = jnp.maximum(ssq[:, 0, :].sum(axis=0) / count - mean * mean, 0.0)
    scale = gamma * jax.lax.rsqrt(var + BN_EPS)
    shift = beta - mean * scale
    return scale, shift


def discriminator_forward(x_nchw, p):
    ndf, nc = p["w1"].shape[0], p["w1"].shape[1]
    N = x_nchw.shape[0]
    kh = kw = 4
    taps = kh * kw

    # real channel widths, lane-padded storage widths, dense contraction depths
    c_in0 = _round_up(max(nc, 1), 8)
    c1r, c2r, c3r, c4r = ndf, ndf * 2, ndf * 4, ndf * 8
    c1p, c2p, c3p, c4p = (_round_up(c, LANE) for c in (c1r, c2r, c3r, c4r))
    K1 = _round_up(taps * c_in0, LANE)
    K2 = _round_up(taps * c1r, LANE)
    K3 = _round_up(taps * c2r, LANE)
    K4 = _round_up(taps * c3r, LANE)

    w1m = prep_conv_weight(p["w1"], c_in0, K1, c1p)
    w2m = prep_conv_weight(p["w2"], c1r, K2, c2p)
    w3m = prep_conv_weight(p["w3"], c2r, K3, c3p)
    w4m = prep_conv_weight(p["w4"], c3r, K4, c4p)
    w5m = prep_final_weight(p["w5"], c4p)
    g2, b2 = _pad_gamma_beta(p["g2"], p["b2"], c2p)
    g3, b3 = _pad_gamma_beta(p["g3"], p["b3"], c3p)
    g4, b4 = _pad_gamma_beta(p["g4"], p["b4"], c4p)

    # NCHW -> NHWC once; image channels rounded up to a sublane multiple; bf16
    x = jnp.transpose(x_nchw, (0, 2, 3, 1))
    x = jnp.pad(x, ((0, 0), (0, 0), (0, 0), (0, c_in0 - nc))).astype(MXU_DTYPE)

    # layer 1: conv + LeakyReLU (fused epilogue); lane-dense bf16 output
    pat, Ho, Wo = im2col_nhwc(x, kh, kw, 2, 1)
    (a1,) = conv_layer(_pad_cols(pat, K1), w1m,
                       out_dtype=MXU_DTYPE, epilogue="lrelu")
    a1 = a1.reshape(N, Ho, Wo, c1p)[..., :c1r]       # real channels -> dense K next

    # layer 2: conv (+ in-kernel BN partial stats), BN2+LReLU applied per element
    pat, Ho, Wo = im2col_nhwc(a1, kh, kw, 2, 1)
    y2, s2, q2 = conv_layer(_pad_cols(pat, K2), w2m,
                            out_dtype=jnp.float32, emit_stats=True)
    scale2, shift2 = _bn_scale_shift(s2, q2, pat.shape[0], g2, b2)
    a2 = bn_lrelu(y2, scale2, shift2, MXU_DTYPE)
    a2 = a2.reshape(N, Ho, Wo, c2p)[..., :c2r]

    # layer 3
    pat, Ho, Wo = im2col_nhwc(a2, kh, kw, 2, 1)
    y3, s3, q3 = conv_layer(_pad_cols(pat, K3), w3m,
                            out_dtype=jnp.float32, emit_stats=True)
    scale3, shift3 = _bn_scale_shift(s3, q3, pat.shape[0], g3, b3)
    a3 = bn_lrelu(y3, scale3, shift3, MXU_DTYPE)
    a3 = a3.reshape(N, Ho, Wo, c3p)[..., :c3r]

    # layers 4+5 fused: conv4 + BN4 (full batch in one block) + LReLU + conv5 + sigmoid
    pat, Ho, Wo = im2col_nhwc(a3, kh, kw, 2, 1)
    num_pos = Ho * Wo
    assert num_pos == taps, "DCGAN discriminator expects a 64x64 input"
    out = tail_layers(_pad_cols(pat, K4), w4m, g4, b4, w5m, N, num_pos)
    return out.reshape(N, 1, 1, 1)


# ----------------------- pure-JAX reference (for check) -------------------- #

def ref_forward(x, p):
    def conv(x, w, s, pad):
        return jax.lax.conv_general_dilated(
            x, w, (s, s), [(pad, pad), (pad, pad)],
            dimension_numbers=("NCHW", "OIHW", "NCHW"))

    def bn(x, g, b, eps=1e-5):
        mean = jnp.mean(x, axis=(0, 2, 3), keepdims=True)
        var = jnp.mean((x - mean) ** 2, axis=(0, 2, 3), keepdims=True)
        return (x - mean) / jnp.sqrt(var + eps) * g.reshape(1, -1, 1, 1) \
            + b.reshape(1, -1, 1, 1)

    lrelu = lambda v: jnp.where(v > 0, v, 0.2 * v)
    x = lrelu(conv(x, p["w1"], 2, 1))
    x = lrelu(bn(conv(x, p["w2"], 2, 1), p["g2"], p["b2"]))
    x = lrelu(bn(conv(x, p["w3"], 2, 1), p["g3"], p["b3"]))
    x = lrelu(bn(conv(x, p["w4"], 2, 1), p["g4"], p["b4"]))
    return jax.nn.sigmoid(conv(x, p["w5"], 1, 0))


# --------------------------------- main ------------------------------------ #

if __name__ == "__main__":
    nc, ndf, N, HW = 3, 8, 2, 64   # 64x64 input required by the 5-layer DCGAN stack

    key = jax.random.PRNGKey(0)
    ks = jax.random.split(key, 6)
    params = {
        "w1": 0.05 * jax.random.normal(ks[0], (ndf, nc, 4, 4), jnp.float32),
        "w2": 0.05 * jax.random.normal(ks[1], (ndf * 2, ndf, 4, 4), jnp.float32),
        "w3": 0.05 * jax.random.normal(ks[2], (ndf * 4, ndf * 2, 4, 4), jnp.float32),
        "w4": 0.05 * jax.random.normal(ks[3], (ndf * 8, ndf * 4, 4, 4), jnp.float32),
        "w5": 0.05 * jax.random.normal(ks[4], (1, ndf * 8, 4, 4), jnp.float32),
        # BatchNorm2d default init: weight=1, bias=0
        "g2": jnp.ones((ndf * 2,), jnp.float32), "b2": jnp.zeros((ndf * 2,), jnp.float32),
        "g3": jnp.ones((ndf * 4,), jnp.float32), "b3": jnp.zeros((ndf * 4,), jnp.float32),
        "g4": jnp.ones((ndf * 8,), jnp.float32), "b4": jnp.zeros((ndf * 8,), jnp.float32),
    }
    x = jax.random.normal(ks[5], (N, nc, HW, HW), jnp.float32)

    fwd = jax.jit(discriminator_forward)
    out = jax.block_until_ready(fwd(x, params))
    ref = jax.block_until_ready(ref_forward(x, params))

    assert out.shape == (N, 1, 1, 1), out.shape
    # bf16 MXU inputs / bf16 stored activations -> relaxed tolerance vs f32 ref
    np.testing.assert_allclose(np.asarray(out), np.asarray(ref),
                               rtol=2e-2, atol=2e-2)
    print("KERNEL_OK")
</pallas_src>

<mosaic_0001>
module attributes {stable_mosaic.version = 11 : i64} {
  func.func @_conv_kernel(%arg0: i32, %arg1: memref<512x128xbf16, #tpu.memory_space<vmem>>, %arg2: memref<128x128xbf16, #tpu.memory_space<vmem>>, %arg3: memref<512x128xbf16, #tpu.memory_space<vmem>>) attributes {dimension_semantics = [#tpu.dimension_semantics<parallel>], iteration_bounds = array<i64: 4>, scalar_prefetch = 0 : i64, scratch_operands = 0 : i64, tpu.core_type = #tpu.core_type<tc>, window_params = [{transform_indices = @transform_0, window_bounds = array<i64: 512, 128>}, {pipeline_mode = #tpu.pipeline_mode<synchronous>, transform_indices = @transform_1, window_bounds = array<i64: 128, 128>}, {transform_indices = @transform_2, window_bounds = array<i64: 512, 128>}]} {
    %c0 = arith.constant 0 : index
    %c0_0 = arith.constant 0 : index
    %0 = vector.load %arg1[%c0, %c0_0] : memref<512x128xbf16, #tpu.memory_space<vmem>>, vector<512x128xbf16>
    %c0_1 = arith.constant 0 : index
    %c0_2 = arith.constant 0 : index
    %1 = vector.load %arg2[%c0_1, %c0_2] : memref<128x128xbf16, #tpu.memory_space<vmem>>, vector<128x128xbf16>
    %cst = arith.constant dense<0.000000e+00> : vector<512x128xf32>
    %2 = tpu.matmul %0, %1, %cst {dimension_numbers = #tpu.dot_dimension_numbers<[1], [0], [0], [1], [0, 0, 1, 1], [], []>} : vector<512x128xbf16>, vector<128x128xbf16>, vector<512x128xf32> -> vector<512x128xf32>
    %cst_3 = arith.constant 0.000000e+00 : f32
    %3 = vector.broadcast %cst_3 : f32 to vector<512x128xf32>
    %4 = arith.cmpf ogt, %2, %3 : vector<512x128xf32>
    %cst_4 = arith.constant 2.000000e-01 : f32
    %5 = vector.broadcast %cst_4 : f32 to vector<512x128xf32>
    %6 = arith.mulf %5, %2 : vector<512x128xf32>
    %7 = arith.select %4, %2, %6 : vector<512x128xi1>, vector<512x128xf32>
    %8 = arith.truncf %7 : vector<512x128xf32> to vector<512x128xbf16>
    %c0_5 = arith.constant 0 : index
    %c0_6 = arith.constant 0 : index
    %9 = vector.load %arg3[%c0_5, %c0_6] : memref<512x128xbf16, #tpu.memory_space<vmem>>, vector<512x128xbf16>
    tpu.vector_store %arg3[%c0_5, %c0_6], %8 {strides = array<i32>} : memref<512x128xbf16, #tpu.memory_space<vmem>>, vector<512x128xbf16>,
    return
  }
  func.func @transform_0(%arg0: i32) -> (i32, i32) {
    %c0_i32 = arith.constant 0 : i32
    %c0_i32_0 = arith.constant 0 : i32
    return %arg0, %c0_i32 : i32, i32
  }
  func.func @transform_1(%arg0: i32) -> (i32, i32) {
    %c0_i32 = arith.constant 0 : i32
    %c0_i32_0 = arith.constant 0 : i32
    %c0_i32_1 = arith.constant 0 : i32
    return %c0_i32, %c0_i32_0 : i32, i32
  }
  func.func @transform_2(%arg0: i32) -> (i32, i32) {
    %c0_i32 = arith.constant 0 : i32
    %c0_i32_0 = arith.constant 0 : i32
    return %arg0, %c0_i32 : i32, i32
  }
}

module attributes {stable_mosaic.version = 11 : i64} {
  func.func @_conv_kernel(%arg0: i32, %arg1: memref<128x128xbf16, #tpu.memory_space<vmem>>, %arg2: memref<128x128xbf16, #tpu.memory_space<vmem>>, %arg3: memref<128x128xf32, #tpu.memory_space<vmem>>, %arg4: memref<1x8x128xf32, #tpu.memory_space<vmem>>, %arg5: memref<1x8x128xf32, #tpu.memory_space<vmem>>) attributes {dimension_semantics = [#tpu.dimension_semantics<parallel>], iteration_bounds = array<i64: 4>, scalar_prefetch = 0 : i64, scratch_operands = 0 : i64, tpu.core_type = #tpu.core_type<tc>, window_params = [{transform_indices = @transform_0, window_bounds = array<i64: 128, 128>}, {pipeline_mode = #tpu.pipeline_mode<synchronous>, transform_indices = @transform_1, window_bounds = array<i64: 128, 128>}, {transform_indices = @transform_2, window_bounds = array<i64: 128, 128>}, {transform_indices = @transform_3, window_bounds = array<i64: 1, 8, 128>}, {transform_indices = @transform_4, window_bounds = array<i64: 1, 8, 128>}]} {
    %c0 = arith.constant 0 : index
    %c0_0 = arith.constant 0 : index
    %0 = vector.load %arg1[%c0, %c0_0] : memref<128x128xbf16, #tpu.memory_space<vmem>>, vector<128x128xbf16>
    %c0_1 = arith.constant 0 : index
    %c0_2 = arith.constant 0 : index
    %1 = vector.load %arg2[%c0_1, %c0_2] : memref<128x128xbf16, #tpu.memory_space<vmem>>, vector<128x128xbf16>
    %cst = arith.constant dense<0.000000e+00> : vector<128x128xf32>
    %2 = tpu.matmul %0, %1, %cst {dimension_numbers = #tpu.dot_dimension_numbers<[1], [0], [0], [1], [0, 0, 1, 1], [], []>} : vector<128x128xbf16>, vector<128x128xbf16>, vector<128x128xf32> -> vector<128x128xf32>
    %cst_3 = arith.constant dense<0.000000e+00> : vector<128xf32>
    %3 = vector.multi_reduction <add>, %2, %cst_3 [0] : vector<128x128xf32> to vector<128xf32>
    %4 = vector.shape_cast %3 : vector<128xf32> to vector<1x128xf32>
    %5 = arith.mulf %2, %2 : vector<128x128xf32>
    %cst_4 = arith.constant dense<0.000000e+00> : vector<128xf32>
    %6 = vector.multi_reduction <add>, %5, %cst_4 [0] : vector<128x128xf32> to vector<128xf32>
    %7 = vector.shape_cast %6 : vector<128xf32> to vector<1x128xf32>
    %8 = vector.shape_cast %4 : vector<1x128xf32> to vector<1x1x128xf32>
    %9 = vector.shape_cast %8 : vector<1x1x128xf32> to vector<1x1x128xf32>
    %10 = vector.broadcast %9 : vector<1x1x128xf32> to vector<1x8x128xf32>
    %c0_5 = arith.constant 0 : index
    %c0_6 = arith.constant 0 : index
    %c0_7 = arith.constant 0 : index
    %11 = vector.load %arg4[%c0_5, %c0_6, %c0_7] : memref<1x8x128xf32, #tpu.memory_space<vmem>>, vector<1x8x128xf32>
    tpu.vector_store %arg4[%c0_5, %c0_6, %c0_7], %10 {strides = array<i32>} : memref<1x8x128xf32, #tpu.memory_space<vmem>>, vector<1x8x128xf32>,
    %12 = vector.shape_cast %7 : vector<1x128xf32> to vector<1x1x128xf32>
    %13 = vector.shape_cast %12 : vector<1x1x128xf32> to vector<1x1x128xf32>
    %14 = vector.broadcast %13 : vector<1x1x128xf32> to vector<1x8x128xf32>
    %c0_8 = arith.constant 0 : index
    %c0_9 = arith.constant 0 : index
    %c0_10 = arith.constant 0 : index
    %15 = vector.load %arg5[%c0_8, %c0_9, %c0_10] : memref<1x8x128xf32, #tpu.memory_space<vmem>>, vector<1x8x128xf32>
    tpu.vector_store %arg5[%c0_8, %c0_9, %c0_10], %14 {strides = array<i32>} : memref<1x8x128xf32, #tpu.memory_space<vmem>>, vector<1x8x128xf32>,
    %c0_11 = arith.constant 0 : index
    %c0_12 = arith.constant 0 : index
    %16 = vector.load %arg3[%c0_11, %c0_12] : memref<128x128xf32, #tpu.memory_space<vmem>>, vector<128x128xf32>
    tpu.vector_store %arg3[%c0_11, %c0_12], %2 {strides = array<i32>} : memref<128x128xf32, #tpu.memory_space<vmem>>, vector<128x128xf32>,
    return
  }
  func.func @transform_0(%arg0: i32) -> (i32, i32) {
    %c0_i32 = arith.constant 0 : i32
    %c0_i32_0 = arith.constant 0 : i32
    return %arg0, %c0_i32 : i32, i32
  }
  func.func @transform_1(%arg0: i32) -> (i32, i32) {
    %c0_i32 = arith.constant 0 : i32
    %c0_i32_0 = arith.constant 0 : i32
    %c0_i32_1 = arith.constant 0 : i32
    return %c0_i32, %c0_i32_0 : i32, i32
  }
  func.func @transform_2(%arg0: i32) -> (i32, i32) {
    %c0_i32 = arith.constant 0 : i32
    %c0_i32_0 = arith.constant 0 : i32
    return %arg0, %c0_i32 : i32, i32
  }
  func.func @transform_3(%arg0: i32) -> (i32, i32, i32) {
    %c0_i32 = arith.constant 0 : i32
    %c0_i32_0 = arith.constant 0 : i32
    %c0_i32_1 = arith.constant 0 : i32
    return %arg0, %c0_i32, %c0_i32_0 : i32, i32, i32
  }
  func.func @transform_4(%arg0: i32) -> (i32, i32, i32) {
    %c0_i32 = arith.constant 0 : i32
    %c0_i32_0 = arith.constant 0 : i32
    %c0_i32_1 = arith.constant 0 : i32
    return %arg0, %c0_i32, %c0_i32_0 : i32, i32, i32
  }
}

module attributes {stable_mosaic.version = 11 : i64} {
  func.func @_bn_lrelu_kernel(%arg0: i32, %arg1: memref<1x128xf32, #tpu.memory_space<vmem>>, %arg2: memref<1x128xf32, #tpu.memory_space<vmem>>, %arg3: memref<128x128xf32, #tpu.memory_space<vmem>>, %arg4: memref<128x128xbf16, #tpu.memory_space<vmem>>) attributes {dimension_semantics = [#tpu.dimension_semantics<parallel>], iteration_bounds = array<i64: 4>, scalar_prefetch = 0 : i64, scratch_operands = 0 : i64, tpu.core_type = #tpu.core_type<tc>, window_params = [{pipeline_mode = #tpu.pipeline_mode<synchronous>, transform_indices = @transform_0, window_bounds = array<i64: 1, 128>}, {pipeline_mode = #tpu.pipeline_mode<synchronous>, transform_indices = @transform_1, window_bounds = array<i64: 1, 128>}, {transform_indices = @transform_2, window_bounds = array<i64: 128, 128>}, {transform_indices = @transform_3, window_bounds = array<i64: 128, 128>}]} {
    %c0 = arith.constant 0 : index
    %c0_0 = arith.constant 0 : index
    %0 = vector.load %arg3[%c0, %c0_0] : memref<128x128xf32, #tpu.memory_space<vmem>>, vector<128x128xf32>
    %c0_1 = arith.constant 0 : index
    %c0_2 = arith.constant 0 : index
    %1 = vector.load %arg1[%c0_1, %c0_2] : memref<1x128xf32, #tpu.memory_space<vmem>>, vector<1x128xf32>
    %2 = vector.broadcast %1 : vector<1x128xf32> to vector<128x128xf32>
    %3 = arith.mulf %0, %2 : vector<128x128xf32>
    %c0_3 = arith.constant 0 : index
    %c0_4 = arith.constant 0 : index
    %4 = vector.load %arg2[%c0_3, %c0_4] : memref<1x128xf32, #tpu.memory_space<vmem>>, vector<1x128xf32>
    %5 = vector.broadcast %4 : vector<1x128xf32> to vector<128x128xf32>
    %6 = arith.addf %3, %5 : vector<128x128xf32>
    %cst = arith.constant 0.000000e+00 : f32
    %7 = vector.broadcast %cst : f32 to vector<128x128xf32>
    %8 = arith.cmpf ogt, %6, %7 : vector<128x128xf32>
    %cst_5 = arith.constant 2.000000e-01 : f32
    %9 = vector.broadcast %cst_5 : f32 to vector<128x128xf32>
    %10 = arith.mulf %9, %6 : vector<128x128xf32>
    %11 = arith.select %8, %6, %10 : vector<128x128xi1>, vector<128x128xf32>
    %12 = arith.truncf %11 : vector<128x128xf32> to vector<128x128xbf16>
    %c0_6 = arith.constant 0 : index
    %c0_7 = arith.constant 0 : index
    %13 = vector.load %arg4[%c0_6, %c0_7] : memref<128x128xbf16, #tpu.memory_space<vmem>>, vector<128x128xbf16>
    tpu.vector_store %arg4[%c0_6, %c0_7], %12 {strides = array<i32>} : memref<128x128xbf16, #tpu.memory_space<vmem>>, vector<128x128xbf16>,
    return
  }
  func.func @transform_0(%arg0: i32) -> (i32, i32) {
    %c0_i32 = arith.constant 0 : i32
    %c0_i32_0 = arith.constant 0 : i32
    %c0_i32_1 = arith.constant 0 : i32
    return %c0_i32, %c0_i32_0 : i32, i32
  }
  func.func @transform_1(%arg0: i32) -> (i32, i32) {
    %c0_i32 = arith.constant 0 : i32
    %c0_i32_0 = arith.constant 0 : i32
    %c0_i32_1 = arith.constant 0 : i32
    return %c0_i32, %c0_i32_0 : i32, i32
  }
  func.func @transform_2(%arg0: i32) -> (i32, i32) {
    %c0_i32 = arith.constant 0 : i32
    %c0_i32_0 = arith.constant 0 : i32
    return %arg0, %c0_i32 : i32, i32
  }
  func.func @transform_3(%arg0: i32) -> (i32, i32) {
    %c0_i32 = arith.constant 0 : i32
    %c0_i32_0 = arith.constant 0 : i32
    return %arg0, %c0_i32 : i32, i32
  }
}

module attributes {stable_mosaic.version = 11 : i64} {
  func.func @_conv_kernel(%arg0: i32, %arg1: memref<128x256xbf16, #tpu.memory_space<vmem>>, %arg2: memref<256x128xbf16, #tpu.memory_space<vmem>>, %arg3: memref<128x128xf32, #tpu.memory_space<vmem>>, %arg4: memref<1x8x128xf32, #tpu.memory_space<vmem>>, %arg5: memref<1x8x128xf32, #tpu.memory_space<vmem>>) attributes {dimension_semantics = [#tpu.dimension_semantics<parallel>], iteration_bounds = array<i64: 1>, scalar_prefetch = 0 : i64, scratch_operands = 0 : i64, tpu.core_type = #tpu.core_type<tc>, window_params = [{transform_indices = @transform_0, window_bounds = array<i64: 128, 256>}, {pipeline_mode = #tpu.pipeline_mode<synchronous>, transform_indices = @transform_1, window_bounds = array<i64: 256, 128>}, {transform_indices = @transform_2, window_bounds = array<i64: 128, 128>}, {transform_indices = @transform_3, window_bounds = array<i64: 1, 8, 128>}, {transform_indices = @transform_4, window_bounds = array<i64: 1, 8, 128>}]} {
    %c0 = arith.constant 0 : index
    %c0_0 = arith.constant 0 : index
    %0 = vector.load %arg1[%c0, %c0_0] : memref<128x256xbf16, #tpu.memory_space<vmem>>, vector<128x256xbf16>
    %c0_1 = arith.constant 0 : index
    %c0_2 = arith.constant 0 : index
    %1 = vector.load %arg2[%c0_1, %c0_2] : memref<256x128xbf16, #tpu.memory_space<vmem>>, vector<256x128xbf16>
    %cst = arith.constant dense<0.000000e+00> : vector<128x128xf32>
    %2 = tpu.matmul %0, %1, %cst {dimension_numbers = #tpu.dot_dimension_numbers<[1], [0], [0], [1], [0, 0, 1, 1], [], []>} : vector<128x256xbf16>, vector<256x128xbf16>, vector<128x128xf32> -> vector<128x128xf32>
    %cst_3 = arith.constant dense<0.000000e+00> : vector<128xf32>
    %3 = vector.multi_reduction <add>, %2, %cst_3 [0] : vector<128x128xf32> to vector<128xf32>
    %4 = vector.shape_cast %3 : vector<128xf32> to vector<1x128xf32>
    %5 = arith.mulf %2, %2 : vector<128x128xf32>
    %cst_4 = arith.constant dense<0.000000e+00> : vector<128xf32>
    %6 = vector.multi_reduction <add>, %5, %cst_4 [0] : vector<128x128xf32> to vector<128xf32>
    %7 = vector.shape_cast %6 : vector<128xf32> to vector<1x128xf32>
    %8 = vector.shape_cast %4 : vector<1x128xf32> to vector<1x1x128xf32>
    %9 = vector.shape_cast %8 : vector<1x1x128xf32> to vector<1x1x128xf32>
    %10 = vector.broadcast %9 : vector<1x1x128xf32> to vector<1x8x128xf32>
    %c0_5 = arith.constant 0 : index
    %c0_6 = arith.constant 0 : index
    %c0_7 = arith.constant 0 : index
    %11 = vector.load %arg4[%c0_5, %c0_6, %c0_7] : memref<1x8x128xf32, #tpu.memory_space<vmem>>, vector<1x8x128xf32>
    tpu.vector_store %arg4[%c0_5, %c0_6, %c0_7], %10 {strides = array<i32>} : memref<1x8x128xf32, #tpu.memory_space<vmem>>, vector<1x8x128xf32>,
    %12 = vector.shape_cast %7 : vector<1x128xf32> to vector<1x1x128xf32>
    %13 = vector.shape_cast %12 : vector<1x1x128xf32> to vector<1x1x128xf32>
    %14 = vector.broadcast %13 : vector<1x1x128xf32> to vector<1x8x128xf32>
    %c0_8 = arith.constant 0 : index
    %c0_9 = arith.constant 0 : index
    %c0_10 = arith.constant 0 : index
    %15 = vector.load %arg5[%c0_8, %c0_9, %c0_10] : memref<1x8x128xf32, #tpu.memory_space<vmem>>, vector<1x8x128xf32>
    tpu.vector_store %arg5[%c0_8, %c0_9, %c0_10], %14 {strides = array<i32>} : memref<1x8x128xf32, #tpu.memory_space<vmem>>, vector<1x8x128xf32>,
    %c0_11 = arith.constant 0 : index
    %c0_12 = arith.constant 0 : index
    %16 = vector.load %arg3[%c0_11, %c0_12] : memref<128x128xf32, #tpu.memory_space<vmem>>, vector<128x128xf32>
    tpu.vector_store %arg3[%c0_11, %c0_12], %2 {strides = array<i32>} : memref<128x128xf32, #tpu.memory_space<vmem>>, vector<128x128xf32>,
    return
  }
  func.func @transform_0(%arg0: i32) -> (i32, i32) {
    %c0_i32 = arith.constant 0 : i32
    %c0_i32_0 = arith.constant 0 : i32
    return %arg0, %c0_i32 : i32, i32
  }
  func.func @transform_1(%arg0: i32) -> (i32, i32) {
    %c0_i32 = arith.constant 0 : i32
    %c0_i32_0 = arith.constant 0 : i32
    %c0_i32_1 = arith.constant 0 : i32
    return %c0_i32, %c0_i32_0 : i32, i32
  }
  func.func @transform_2(%arg0: i32) -> (i32, i32) {
    %c0_i32 = arith.constant 0 : i32
    %c0_i32_0 = arith.constant 0 : i32
    return %arg0, %c0_i32 : i32, i32
  }
  func.func @transform_3(%arg0: i32) -> (i32, i32, i32) {
    %c0_i32 = arith.constant 0 : i32
    %c0_i32_0 = arith.constant 0 : i32
    %c0_i32_1 = arith.constant 0 : i32
    return %arg0, %c0_i32, %c0_i32_0 : i32, i32, i32
  }
  func.func @transform_4(%arg0: i32) -> (i32, i32, i32) {
    %c0_i32 = arith.constant 0 : i32
    %c0_i32_0 = arith.constant 0 : i32
    %c0_i32_1 = arith.constant 0 : i32
    return %arg0, %c0_i32, %c0_i32_0 : i32, i32, i32
  }
}

module attributes {stable_mosaic.version = 11 : i64} {
  func.func @_bn_lrelu_kernel(%arg0: i32, %arg1: memref<1x128xf32, #tpu.memory_space<vmem>>, %arg2: memref<1x128xf32, #tpu.memory_space<vmem>>, %arg3: memref<128x128xf32, #tpu.memory_space<vmem>>, %arg4: memref<128x128xbf16, #tpu.memory_space<vmem>>) attributes {dimension_semantics = [#tpu.dimension_semantics<parallel>], iteration_bounds = array<i64: 1>, scalar_prefetch = 0 : i64, scratch_operands = 0 : i64, tpu.core_type = #tpu.core_type<tc>, window_params = [{pipeline_mode = #tpu.pipeline_mode<synchronous>, transform_indices = @transform_0, window_bounds = array<i64: 1, 128>}, {pipeline_mode = #tpu.pipeline_mode<synchronous>, transform_indices = @transform_1, window_bounds = array<i64: 1, 128>}, {transform_indices = @transform_2, window_bounds = array<i64: 128, 128>}, {transform_indices = @transform_3, window_bounds = array<i64: 128, 128>}]} {
    %c0 = arith.constant 0 : index
    %c0_0 = arith.constant 0 : index
    %0 = vector.load %arg3[%c0, %c0_0] : memref<128x128xf32, #tpu.memory_space<vmem>>, vector<128x128xf32>
    %c0_1 = arith.constant 0 : index
    %c0_2 = arith.constant 0 : index
    %1 = vector.load %arg1[%c0_1, %c0_2] : memref<1x128xf32, #tpu.memory_space<vmem>>, vector<1x128xf32>
    %2 = vector.broadcast %1 : vector<1x128xf32> to vector<128x128xf32>
    %3 = arith.mulf %0, %2 : vector<128x128xf32>
    %c0_3 = arith.constant 0 : index
    %c0_4 = arith.constant 0 : index
    %4 = vector.load %arg2[%c0_3, %c0_4] : memref<1x128xf32, #tpu.memory_space<vmem>>, vector<1x128xf32>
    %5 = vector.broadcast %4 : vector<1x128xf32> to vector<128x128xf32>
    %6 = arith.addf %3, %5 : vector<128x128xf32>
    %cst = arith.constant 0.000000e+00 : f32
    %7 = vector.broadcast %cst : f32 to vector<128x128xf32>
    %8 = arith.cmpf ogt, %6, %7 : vector<128x128xf32>
    %cst_5 = arith.constant 2.000000e-01 : f32
    %9 = vector.broadcast %cst_5 : f32 to vector<128x128xf32>
    %10 = arith.mulf %9, %6 : vector<128x128xf32>
    %11 = arith.select %8, %6, %10 : vector<128x128xi1>, vector<128x128xf32>
    %12 = arith.truncf %11 : vector<128x128xf32> to vector<128x128xbf16>
    %c0_6 = arith.constant 0 : index
    %c0_7 = arith.constant 0 : index
    %13 = vector.load %arg4[%c0_6, %c0_7] : memref<128x128xbf16, #tpu.memory_space<vmem>>, vector<128x128xbf16>
    tpu.vector_store %arg4[%c0_6, %c0_7], %12 {strides = array<i32>} : memref<128x128xbf16, #tpu.memory_space<vmem>>, vector<128x128xbf16>,
    return
  }
  func.func @transform_0(%arg0: i32) -> (i32, i32) {
    %c0_i32 = arith.constant 0 : i32
    %c0_i32_0 = arith.constant 0 : i32
    %c0_i32_1 = arith.constant 0 : i32
    return %c0_i32, %c0_i32_0 : i32, i32
  }
  func.func @transform_1(%arg0: i32) -> (i32, i32) {
    %c0_i32 = arith.constant 0 : i32
    %c0_i32_0 = arith.constant 0 : i32
    %c0_i32_1 = arith.constant 0 : i32
    return %c0_i32, %c0_i32_0 : i32, i32
  }
  func.func @transform_2(%arg0: i32) -> (i32, i32) {
    %c0_i32 = arith.constant 0 : i32
    %c0_i32_0 = arith.constant 0 : i32
    return %arg0, %c0_i32 : i32, i32
  }
  func.func @transform_3(%arg0: i32) -> (i32, i32) {
    %c0_i32 = arith.constant 0 : i32
    %c0_i32_0 = arith.constant 0 : i32
    return %arg0, %c0_i32 : i32, i32
  }
}

module attributes {stable_mosaic.version = 11 : i64} {
  func.func @_tail_kernel(%arg0: i32, %arg1: memref<32x512xbf16, #tpu.memory_space<vmem>>, %arg2: memref<512x128xbf16, #tpu.memory_space<vmem>>, %arg3: memref<1x128xf32, #tpu.memory_space<vmem>>, %arg4: memref<1x128xf32, #tpu.memory_space<vmem>>, %arg5: memref<16x128xf32, #tpu.memory_space<vmem>>, %arg6: memref<2x1x1xf32, #tpu.memory_space<vmem>>) attributes {dimension_semantics = [#tpu.dimension_semantics<arbitrary>], iteration_bounds = array<i64: 1>, scalar_prefetch = 0 : i64, scratch_operands = 0 : i64, tpu.core_type = #tpu.core_type<tc>, window_params = [{pipeline_mode = #tpu.pipeline_mode<synchronous>, transform_indices = @transform_0, window_bounds = array<i64: 32, 512>}, {pipeline_mode = #tpu.pipeline_mode<synchronous>, transform_indices = @transform_1, window_bounds = array<i64: 512, 128>}, {pipeline_mode = #tpu.pipeline_mode<synchronous>, transform_indices = @transform_2, window_bounds = array<i64: 1, 128>}, {pipeline_mode = #tpu.pipeline_mode<synchronous>, transform_indices = @transform_3, window_bounds = array<i64: 1, 128>}, {pipeline_mode = #tpu.pipeline_mode<synchronous>, transform_indices = @transform_4, window_bounds = array<i64: 16, 128>}, {pipeline_mode = #tpu.pipeline_mode<synchronous>, transform_indices = @transform_5, window_bounds = array<i64: 2, 1, 1>}]} {
    %c0 = arith.constant 0 : index
    %c0_0 = arith.constant 0 : index
    %0 = vector.load %arg1[%c0, %c0_0] : memref<32x512xbf16, #tpu.memory_space<vmem>>, vector<32x512xbf16>
    %c0_1 = arith.constant 0 : index
    %c0_2 = arith.constant 0 : index
    %1 = vector.load %arg2[%c0_1, %c0_2] : memref<512x128xbf16, #tpu.memory_space<vmem>>, vector<512x128xbf16>
    %cst = arith.constant dense<0.000000e+00> : vector<32x128xf32>
    %2 = tpu.matmul %0, %1, %cst {dimension_numbers = #tpu.dot_dimension_numbers<[1], [0], [0], [1], [0, 0, 1, 1], [], []>} : vector<32x512xbf16>, vector<512x128xbf16>, vector<32x128xf32> -> vector<32x128xf32>
    %cst_3 = arith.constant dense<0.000000e+00> : vector<128xf32>
    %3 = vector.multi_reduction <add>, %2, %cst_3 [0] : vector<32x128xf32> to vector<128xf32>
    %4 = vector.shape_cast %3 : vector<128xf32> to vector<1x128xf32>
    %cst_4 = arith.constant 3.200000e+01 : f32
    %5 = vector.broadcast %cst_4 : f32 to vector<1x128xf32>
    %6 = arith.divf %4, %5 : vector<1x128xf32>
    %7 = arith.mulf %2, %2 : vector<32x128xf32>
    %cst_5 = arith.constant dense<0.000000e+00> : vector<128xf32>
    %8 = vector.multi_reduction <add>, %7, %cst_5 [0] : vector<32x128xf32> to vector<128xf32>
    %9 = vector.shape_cast %8 : vector<128xf32> to vector<1x128xf32>
    %cst_6 = arith.constant 3.200000e+01 : f32
    %10 = vector.broadcast %cst_6 : f32 to vector<1x128xf32>
    %11 = arith.divf %9, %10 : vector<1x128xf32>
    %12 = arith.mulf %6, %6 : vector<1x128xf32>
    %13 = arith.subf %11, %12 : vector<1x128xf32>
    %cst_7 = arith.constant 0.000000e+00 : f32
    %14 = vector.broadcast %cst_7 : f32 to vector<1x128xf32>
    %15 = arith.maximumf %13, %14 : vector<1x128xf32>
    %c0_8 = arith.constant 0 : index
    %c0_9 = arith.constant 0 : index
    %16 = vector.load %arg3[%c0_8, %c0_9] : memref<1x128xf32, #tpu.memory_space<vmem>>, vector<1x128xf32>
    %cst_10 = arith.constant 9.99999974E-6 : f32
    %17 = vector.broadcast %cst_10 : f32 to vector<1x128xf32>
    %18 = arith.addf %15, %17 : vector<1x128xf32>
    %19 = math.rsqrt %18 : vector<1x128xf32>
    %20 = arith.mulf %16, %19 : vector<1x128xf32>
    %c0_11 = arith.constant 0 : index
    %c0_12 = arith.constant 0 : index
    %21 = vector.load %arg4[%c0_11, %c0_12] : memref<1x128xf32, #tpu.memory_space<vmem>>, vector<1x128xf32>
    %22 = arith.mulf %6, %20 : vector<1x128xf32>
    %23 = arith.subf %21, %22 : vector<1x128xf32>
    %24 = vector.broadcast %20 : vector<1x128xf32> to vector<32x128xf32>
    %25 = arith.mulf %2, %24 : vector<32x128xf32>
    %26 = vector.broadcast %23 : vector<1x128xf32> to vector<32x128xf32>
    %27 = arith.addf %25, %26 : vector<32x128xf32>
    %cst_13 = arith.constant 0.000000e+00 : f32
    %28 = vector.broadcast %cst_13 : f32 to vector<32x128xf32>
    %29 = arith.cmpf ogt, %27, %28 : vector<32x128xf32>
    %cst_14 = arith.constant 2.000000e-01 : f32
    %30 = vector.broadcast %cst_14 : f32 to vector<32x128xf32>
    %31 = arith.mulf %30, %27 : vector<32x128xf32>
    %32 = arith.select %29, %27, %31 : vector<32x128xi1>, vector<32x128xf32>
    %33 = vector.shape_cast %32 : vector<32x128xf32> to vector<2x16x128xf32>
    %c0_15 = arith.constant 0 : index
    %c0_16 = arith.constant 0 : index
    %34 = vector.load %arg5[%c0_15, %c0_16] : memref<16x128xf32, #tpu.memory_space<vmem>>, vector<16x128xf32>
    %35 = vector.shape_cast %34 : vector<16x128xf32> to vector<1x16x128xf32>
    %36 = vector.broadcast %35 : vector<1x16x128xf32> to vector<2x16x128xf32>
    %37 = arith.mulf %33, %36 : vector<2x16x128xf32>
    %cst_17 = arith.constant dense<0.000000e+00> : vector<2x16xf32>
    %38 = vector.multi_reduction <add>, %37, %cst_17 [2] : vector<2x16x128xf32> to vector<2x16xf32>
    %39 = vector.shape_cast %38 : vector<2x16xf32> to vector<2x16x1xf32>
    %cst_18 = arith.constant dense<0.000000e+00> : vector<2x1xf32>
    %40 = vector.multi_reduction <add>, %39, %cst_18 [1] : vector<2x16x1xf32> to vector<2x1xf32>
    %41 = vector.shape_cast %40 : vector<2x1xf32> to vector<2x1x1xf32>
    %cst_19 = arith.constant 5.000000e-01 : f32
    %42 = vector.broadcast %cst_19 : f32 to vector<2x1x1xf32>
    %43 = arith.mulf %42, %41 : vector<2x1x1xf32>
    %44 = math.tanh %43 : vector<2x1x1xf32>
    %cst_20 = arith.constant 1.000000e+00 : f32
    %45 = vector.broadcast %cst_20 : f32 to vector<2x1x1xf32>
    %46 = arith.addf %44, %45 : vector<2x1x1xf32>
    %cst_21 = arith.constant 5.000000e-01 : f32
    %47 = vector.broadcast %cst_21 : f32 to vector<2x1x1xf32>
    %48 = arith.mulf %47, %46 : vector<2x1x1xf32>
    %c0_22 = arith.constant 0 : index
    %c0_23 = arith.constant 0 : index
    %c0_24 = arith.constant 0 : index
    %49 = vector.load %arg6[%c0_22, %c0_23, %c0_24] : memref<2x1x1xf32, #tpu.memory_space<vmem>>, vector<2x1x1xf32>
    tpu.vector_store %arg6[%c0_22, %c0_23, %c0_24], %48 {strides = array<i32>} : memref<2x1x1xf32, #tpu.memory_space<vmem>>, vector<2x1x1xf32>,
    return
  }
  func.func @transform_0(%arg0: i32) -> (i32, i32) {
    %c0_i32 = arith.constant 0 : i32
    %c0_i32_0 = arith.constant 0 : i32
    %c0_i32_1 = arith.constant 0 : i32
    return %c0_i32, %c0_i32_0 : i32, i32
  }
  func.func @transform_1(%arg0: i32) -> (i32, i32) {
    %c0_i32 = arith.constant 0 : i32
    %c0_i32_0 = arith.constant 0 : i32
    %c0_i32_1 = arith.constant 0 : i32
    return %c0_i32, %c0_i32_0 : i32, i32
  }
  func.func @transform_2(%arg0: i32) -> (i32, i32) {
    %c0_i32 = arith.constant 0 : i32
    %c0_i32_0 = arith.constant 0 : i32
    %c0_i32_1 = arith.constant 0 : i32
    return %c0_i32, %c0_i32_0 : i32, i32
  }
  func.func @transform_3(%arg0: i32) -> (i32, i32) {
    %c0_i32 = arith.constant 0 : i32
    %c0_i32_0 = arith.constant 0 : i32
    %c0_i32_1 = arith.constant 0 : i32
    return %c0_i32, %c0_i32_0 : i32, i32
  }
  func.func @transform_4(%arg0: i32) -> (i32, i32) {
    %c0_i32 = arith.constant 0 : i32
    %c0_i32_0 = arith.constant 0 : i32
    %c0_i32_1 = arith.constant 0 : i32
    return %c0_i32, %c0_i32_0 : i32, i32
  }
  func.func @transform_5(%arg0: i32) -> (i32, i32, i32) {
    %c0_i32 = arith.constant 0 : i32
    %c0_i32_0 = arith.constant 0 : i32
    %c0_i32_1 = arith.constant 0 : i32
    %c0_i32_2 = arith.constant 0 : i32
    return %c0_i32, %c0_i32_0, %c0_i32_1 : i32, i32, i32
  }
}

</mosaic_0001>

<bundles_post_ra>
// kernel: discriminator_forward.6
= control target key start
LH: loop header
LB: loop body
LE: loop exit
PB: predicated region body
PF: predicated region fallthrough
CT: control target
= control target key end

     0   :  { %s1902_s9 = smov 0   ;;  %s2027_s0 = inlined_call_operand.vmem [shape: bf16[2048,128], index: 0, kind: input, shape index: {}]   ;;  %s2028_s1 = inlined_call_operand.vmem [shape: bf16[128,128], index: 1, kind: input, shape index: {}]   ;;  %s2029_s2 = inlined_call_operand.vmem [shape: bf16[2048,128], index: 2, kind: output, shape index: {}]  }
   0x1 LB: > { %s1325_s10 = sadd.s32 4294967295, %s1885_s9   ;;  %p1329_p0 = scmp.ge.s32.totalorder %s1885_s9, 1  ;;  %s1885_s9 = sphi %s1902_s9, %s12_s9  }
   0x2   : > { %p113_p1 = scmp.lt.s32.totalorder %s1885_s9, 5 }
   0x4   : > { %p114_p2 = pnand %p1329_p0, %p113_p1 }
   0x5   : > { %s1330_s13 = sshll.u32 (!%p114_p2), %s1325_s10, 6 }
   0x6   : > { %117 = sbr.rel (%p114_p2) target bundleno = 306 (0x132), region = 28  ;;  %p136_p3 = scmp.lt.s32.totalorder (!%p114_p2), %s1330_s13, 255 }
   0xb   : > { %v1839_v0 = vld [vmem:[%s2028_s1 + $0x38] sm:$0xff]   ;;  %v1840_v1 = vld [vmem:[%s2028_s1 + $0x30] sm:$0xff]   ;;  %s2031_s13 = smov (!%p136_p3, %s1330_s13), 255  ;;  %v1841_v2 = vld [vmem:[%s2028_s1 + $0x28] sm:$0xff]  }
   0xc   : > { %1735 = vmatprep.subr.bf16.mxu0 %v1839_v0  ;;  %1815 = vmatprep.subr.bf16.mxu1 %v1839_v0  ;;  %s1331_s18 = sshll.u32 %s2031_s13, 2  ;;  %v1842_v3 = vld [vmem:[%s2028_s1 + $0x20] sm:$0xff]   ;;  %v1843_v6 = vld [vmem:[%s2028_s1 + $0x18] sm:$0xff]   ;;  %v1844_v7 = vld [vmem:[%s2028_s1 + $0x10] sm:$0xff]  }
   0xd   : > { %1736 = vmatpush3.bf16.msra.mxu0 %v1839_v0  ;;  %1823 = vmatpush3.bf16.msra.mxu1 %v1839_v0  ;;  %s1927_s21 = scalar_lea.vmem %s2027_s0, %s1331_s18  ;;  %v1845_v8 = vld [vmem:[%s2028_s1 + $0x8] sm:$0xff]   ;;  %v1846_v9 = vld [vmem:[%s2028_s1] sm:$0xff]   ;;  %s1981_s6 = scalar_lea.vmem %s2029_s2, %s1331_s18 }
   0xe   : > { %1737 = vmatprep.subr.bf16.mxu0 %v1840_v1  ;;  %1816 = vmatprep.subr.bf16.mxu1 %v1840_v1  ;;  %v1847_v4 = vld [vmem:[%s1927_s21] sm:$0xff]   ;;  %v1849_v10 = vld [vmem:[%s1927_s21 + $0x8] sm:$0xff]   ;;  %v1851_v12 = vld [vmem:[%s1927_s21 + $0x10] sm:$0xff]  }
   0xf   : > { %v1848_v5 = vld [vmem:[%s1927_s21 + $0x80] sm:$0xff]   ;;  %1751 = vmatprep.mubr.bf16.mxu0 %v1847_v4  ;;  %v1850_v11 = vld [vmem:[%s1927_s21 + $0x88] sm:$0xff]   ;;  %v1852_v13 = vld [vmem:[%s1927_s21 + $0x90] sm:$0xff]  }
  0x10   : > { %1783 = vmatprep.mubr.bf16.mxu1 %v1848_v5  ;;  %v1853_v14 = vld [vmem:[%s1927_s21 + $0x18] sm:$0xff]   ;;  %v1855_v16 = vld [vmem:[%s1927_s21 + $0x20] sm:$0xff]   ;;  %v1857_v18 = vld [vmem:[%s1927_s21 + $0x28] sm:$0xff]  }
  0x11   : > { %1738 = vmatpush3.bf16.msra.mxu0 %v1840_v1  ;;  %1824 = vmatpush3.bf16.msra.mxu1 %v1840_v1  ;;  %v1854_v15 = vld [vmem:[%s1927_s21 + $0x98] sm:$0xff]   ;;  %v1856_v17 = vld [vmem:[%s1927_s21 + $0xa0] sm:$0xff]   ;;  %v1858_v19 = vld [vmem:[%s1927_s21 + $0xa8] sm:$0xff]  }
  0x12   : > { %1739 = vmatprep.subr.bf16.mxu0 %v1841_v2  ;;  %1817 = vmatprep.subr.bf16.mxu1 %v1841_v2  ;;  %v1859_v20 = vld [vmem:[%s1927_s21 + $0x30] sm:$0xff]   ;;  %v1861_v22 = vld [vmem:[%s1927_s21 + $0x38] sm:$0xff]   ;;  %v1863_v24 = vld [vmem:[%s1927_s21 + $0x40] sm:$0xff]  }
  0x13   : > { %v1860_v21 = vld [vmem:[%s1927_s21 + $0xb0] sm:$0xff]   ;;  %v1862_v23 = vld [vmem:[%s1927_s21 + $0xb8] sm:$0xff]   ;;  %v1864_v25 = vld [vmem:[%s1927_s21 + $0xc0] sm:$0xff]  }
  0x14   : > { %v1865_v26 = vld [vmem:[%s1927_s21 + $0x48] sm:$0xff]   ;;  %v1867_v28 = vld [vmem:[%s1927_s21 + $0x50] sm:$0xff]   ;;  %v1869_v30 = vld [vmem:[%s1927_s21 + $0x58] sm:$0xff]  }
  0x15   : > { %1740 = vmatpush3.bf16.msra.mxu0 %v1841_v2  ;;  %1825 = vmatpush3.bf16.msra.mxu1 %v1841_v2  ;;  %v1866_v27 = vld [vmem:[%s1927_s21 + $0xc8] sm:$0xff]   ;;  %v1868_v29 = vld [vmem:[%s1927_s21 + $0xd0] sm:$0xff]   ;;  %v1870_v31 = vld [vmem:[%s1927_s21 + $0xd8] sm:$0xff]  }
  0x16   : > { %1741 = vmatprep.subr.bf16.mxu0 %v1842_v3  ;;  %1818 = vmatprep.subr.bf16.mxu1 %v1842_v3  ;;  %v1871_v32 = vld [vmem:[%s1927_s21 + $0x60] sm:$0xff]   ;;  %v1873_v34 = vld [vmem:[%s1927_s21 + $0x68] sm:$0xff]   ;;  %v1875_v36 = vld [vmem:[%s1927_s21 + $0x70] sm:$0xff]  }
  0x17   : > { %v1872_v33 = vld [vmem:[%s1927_s21 + $0xe0] sm:$0xff]   ;;  %v1874_v35 = vld [vmem:[%s1927_s21 + $0xe8] sm:$0xff]   ;;  %v1876_v37 = vld [vmem:[%s1927_s21 + $0xf0] sm:$0xff]  }
  0x18   : > { %v1877_v38 = vld [vmem:[%s1927_s21 + $0x78] sm:$0xff]  }
  0x19   : > { %1742 = vmatpush3.bf16.msra.mxu0 %v1842_v3  ;;  %1826 = vmatpush3.bf16.msra.mxu1 %v1842_v3  ;;  %v1878_v39 = vld [vmem:[%s1927_s21 + $0xf8] sm:$0xff]  }
  0x1a   : > { %1743 = vmatprep.subr.bf16.mxu0 %v1843_v6  ;;  %1819 = vmatprep.subr.bf16.mxu1 %v1843_v6 }
  0x1d   : > { %1744 = vmatpush3.bf16.msra.mxu0 %v1843_v6  ;;  %1827 = vmatpush3.bf16.msra.mxu1 %v1843_v6 }
  0x1e   : > { %1745 = vmatprep.subr.bf16.mxu0 %v1844_v7  ;;  %1820 = vmatprep.subr.bf16.mxu1 %v1844_v7 }
  0x21   : > { %1746 = vmatpush3.bf16.msra.mxu0 %v1844_v7  ;;  %1828 = vmatpush3.bf16.msra.mxu1 %v1844_v7 }
  0x22   : > { %1747 = vmatprep.subr.bf16.mxu0 %v1845_v8  ;;  %1821 = vmatprep.subr.bf16.mxu1 %v1845_v8 }
  0x25   : > { %1748 = vmatpush3.bf16.msra.mxu0 %v1845_v8  ;;  %1829 = vmatpush3.bf16.msra.mxu1 %v1845_v8 }
  0x26   : > { %1749 = vmatprep.subr.bf16.mxu0 %v1846_v9  ;;  %1822 = vmatprep.subr.bf16.mxu1 %v1846_v9 }
  0x29   : > { %1750 = vmatpush3.bf16.msra.mxu0 %v1846_v9  ;;  %1830 = vmatpush3.bf16.msra.mxu1 %v1846_v9 }
  0x2c   : > { %1752 = vmatmul.mubr.bf16.vlgmr.msra.gmra.mxu0 %v1849_v10  ;;  %1784 = vmatmul.mubr.bf16.vlgmr.msra.gmra.mxu1 %v1850_v11 }
  0x2d   : > { %1755 = vmatprep.mubr.bf16.mxu0 %v1851_v12  ;;  %1787 = vmatprep.mubr.bf16.mxu1 %v1852_v13 }
  0x34   : > { %1756 = vmatmul.mubr.bf16.gmra.mxu0 %v1853_v14  ;;  %1788 = vmatmul.mubr.bf16.gmra.mxu1 %v1854_v15 }
  0x35   : > { %1759 = vmatprep.mubr.bf16.mxu0 %v1855_v16  ;;  %1791 = vmatprep.mubr.bf16.mxu1 %v1856_v17 }
  0x3c   : > { %1760 = vmatmul.mubr.bf16.gmra.mxu0 %v1857_v18  ;;  %1792 = vmatmul.mubr.bf16.gmra.mxu1 %v1858_v19 }
  0x3d   : > { %1763 = vmatprep.mubr.bf16.mxu0 %v1859_v20  ;;  %1795 = vmatprep.mubr.bf16.mxu1 %v1860_v21 }
  0x44   : > { %1764 = vmatmul.mubr.bf16.gmra.mxu0 %v1861_v22  ;;  %1796 = vmatmul.mubr.bf16.gmra.mxu1 %v1862_v23 }
  0x45   : > { %1767 = vmatprep.mubr.bf16.mxu0 %v1863_v24  ;;  %1799 = vmatprep.mubr.bf16.mxu1 %v1864_v25 }
  0x4c   : > { %1768 = vmatmul.mubr.bf16.gmra.mxu0 %v1865_v26  ;;  %1800 = vmatmul.mubr.bf16.gmra.mxu1 %v1866_v27 }
  0x4d   : > { %1771 = vmatprep.mubr.bf16.mxu0 %v1867_v28  ;;  %1803 = vmatprep.mubr.bf16.mxu1 %v1868_v29 }
  0x54   : > { %1772 = vmatmul.mubr.bf16.gmra.mxu0 %v1869_v30  ;;  %1804 = vmatmul.mubr.bf16.gmra.mxu1 %v1870_v31 }
  0x55   : > { %1775 = vmatprep.mubr.bf16.mxu0 %v1871_v32  ;;  %1807 = vmatprep.mubr.bf16.mxu1 %v1872_v33 }
  0x5c   : > { %1776 = vmatmul.mubr.bf16.gmra.mxu0 %v1873_v34  ;;  %1808 = vmatmul.mubr.bf16.gmra.mxu1 %v1874_v35 }
  0x5d   : > { %1779 = vmatprep.mubr.bf16.mxu0 %v1875_v36  ;;  %1811 = vmatprep.mubr.bf16.mxu1 %v1876_v37 }
  0x64   : > { %1780 = vmatmul.mubr.bf16.gmra.mxu0 %v1877_v38  ;;  %1812 = vmatmul.mubr.bf16.gmra.mxu1 %v1878_v39 }
  0xec   : > { %v1753_v40 = vpop.f32.mrf.mxu0  ;;  %v1785_v41 = vpop.f32.mrf.mxu1 }
  0xed   : > { %vm759_vm0 = vcmp.gt.f32.partialorder %v1753_v40, 0.0  ;;  %v823_v42 = vmul.f32 0.2, %v1753_v40  ;;  %v855_v43 = vmul.f32 0.2, %v1785_v41  ;;  %vm791_vm1 = vcmp.gt.f32.partialorder %v1785_v41, 0.0 }
  0xee   : > { %v502_v44 = vpop.f32.mrf.mxu0  ;;  %v630_v45 = vpop.f32.mrf.mxu1 }
  0xef   : > { %v887_v46 = vsel %vm759_vm0, %v1753_v40, %v823_v42  ;;  %v821_v47 = vmul.f32 0.2, %v502_v44  ;;  %vm757_vm2 = vcmp.gt.f32.partialorder %v502_v44, 0.0  ;;  %v919_v51 = vsel %vm791_vm1, %v1785_v41, %v855_v43 }
  0xf0   : > { %v1754_v48 = vpop.f32.mrf.mxu0  ;;  %v1786_v49 = vpop.f32.mrf.mxu1  ;;  %vm789_vm5 = vcmp.gt.f32.partialorder %v630_v45, 0.0  ;;  %v853_v52 = vmul.f32 0.2, %v630_v45 }
  0xf1   : > { %vm760_vm3 = vcmp.gt.f32.partialorder %v1754_v48, 0.0  ;;  %v824_v50 = vmul.f32 0.2, %v1754_v48  ;;  %vm792_vm4 = vcmp.gt.f32.partialorder %v1786_v49, 0.0  ;;  %v856_v53 = vmul.f32 0.2, %v1786_v49 }
  0xf2   : > { %v505_v54 = vpop.f32.mrf.mxu0  ;;  %v633_v55 = vpop.f32.mrf.mxu1  ;;  %v885_v58 = vsel %vm757_vm2, %v502_v44, %v821_v47  ;;  %v917_v3 = vsel %vm789_vm5, %v630_v45, %v853_v52 }
  0xf3   : > { %v888_v56 = vsel %vm760_vm3, %v1754_v48, %v824_v50  ;;  %vm758_vm6 = vcmp.gt.f32.partialorder %v505_v54, 0.0  ;;  %v822_v57 = vmul.f32 0.2, %v505_v54  ;;  %vm790_vm7 = vcmp.gt.f32.partialorder %v633_v55, 0.0 }
  0xf4   : > { %v1512_v59 = vpack.c.bf16 %v888_v56, %v887_v46  ;;  %v920_v60 = vsel %vm792_vm4, %v1786_v49, %v856_v53  ;;  %v854_v61 = vmul.f32 0.2, %v633_v55  ;;  %v1757_v62 = vpop.f32.mrf.mxu0  ;;  %v1789_v63 = vpop.f32.mrf.mxu1 }
  0xf5   : > { %v1592_v0 = vpack.c.bf16 %v920_v60, %v919_v51  ;;  %v886_v1 = vsel %vm758_vm6, %v505_v54, %v822_v57  ;;  %vm763_vm8 = vcmp.gt.f32.partialorder %v1757_v62, 0.0  ;;  %v827_v2 = vmul.f32 0.2, %v1757_v62 }
  0xf6   : > { %1664 = vst [vmem:[%s1981_s6 + $0x8] sm:$0xff] %v1512_v59   ;;  %v1507_v4 = vpack.c.bf16 %v886_v1, %v885_v58  ;;  %v918_v5 = vsel %vm790_vm7, %v633_v55, %v854_v61  ;;  %v859_v6 = vmul.f32 0.2, %v1789_v63  ;;  %v518_v7 = vpop.f32.mrf.mxu0  ;;  %v646_v8 = vpop.f32.mrf.mxu1  ;;  %vm795_vm9 = vcmp.gt.f32.partialorder %v1789_v63, 0.0 }
  0xf7   : > { %1680 = vst [vmem:[%s1981_s6 + $0x88] sm:$0xff] %v1592_v0   ;;  %v1587_v9 = vpack.c.bf16 %v918_v5, %v917_v3  ;;  %v891_v10 = vsel %vm763_vm8, %v1757_v62, %v827_v2  ;;  %v825_v11 = vmul.f32 0.2, %v518_v7  ;;  %vm761_vm10 = vcmp.gt.f32.partialorder %v518_v7, 0.0 }
  0xf8   : > { %1508 = vst [vmem:[%s1981_s6] sm:$0xff] %v1507_v4   ;;  %v1758_v12 = vpop.f32.mrf.mxu0  ;;  %v1790_v13 = vpop.f32.mrf.mxu1  ;;  %v923_v15 = vsel %vm795_vm9, %v1789_v63, %v859_v6  ;;  %vm793_vm13 = vcmp.gt.f32.partialorder %v646_v8, 0.0  ;;  %v857_v16 = vmul.f32 0.2, %v646_v8 }
  0xf9   : > { %1679 = vst [vmem:[%s1981_s6 + $0x80] sm:$0xff] %v1587_v9   ;;  %vm764_vm11 = vcmp.gt.f32.partialorder %v1758_v12, 0.0  ;;  %v828_v14 = vmul.f32 0.2, %v1758_v12  ;;  %vm796_vm12 = vcmp.gt.f32.partialorder %v1790_v13, 0.0  ;;  %v889_v22 = vsel %vm761_vm10, %v518_v7, %v825_v11 }
  0xfa   : > { %v860_v17 = vmul.f32 0.2, %v1790_v13  ;;  %v521_v18 = vpop.f32.mrf.mxu0  ;;  %v649_v19 = vpop.f32.mrf.mxu1  ;;  %v921_v31 = vsel %vm793_vm13, %v646_v8, %v857_v16 }
  0xfb   : > { %v892_v20 = vsel %vm764_vm11, %v1758_v12, %v828_v14  ;;  %vm762_vm14 = vcmp.gt.f32.partialorder %v521_v18, 0.0  ;;  %v826_v21 = vmul.f32 0.2, %v521_v18  ;;  %vm794_vm15 = vcmp.gt.f32.partialorder %v649_v19, 0.0 }
  0xfc   : > { %v1522_v23 = vpack.c.bf16 %v892_v20, %v891_v10  ;;  %v924_v24 = vsel %vm796_vm12, %v1790_v13, %v860_v17  ;;  %v858_v25 = vmul.f32 0.2, %v649_v19  ;;  %v1761_v26 = vpop.f32.mrf.mxu0  ;;  %v1793_v27 = vpop.f32.mrf.mxu1 }
  0xfd   : > { %v1602_v28 = vpack.c.bf16 %v924_v24, %v923_v15  ;;  %v890_v29 = vsel %vm762_vm14, %v521_v18, %v826_v21  ;;  %vm767_vm0 = vcmp.gt.f32.partialorder %v1761_v26, 0.0  ;;  %v831_v30 = vmul.f32 0.2, %v1761_v26 }
  0xfe   : > { %1666 = vst [vmem:[%s1981_s6 + $0x18] sm:$0xff] %v1522_v23   ;;  %v1517_v32 = vpack.c.bf16 %v890_v29, %v889_v22  ;;  %v922_v33 = vsel %vm794_vm15, %v649_v19, %v858_v25  ;;  %v863_v34 = vmul.f32 0.2, %v1793_v27  ;;  %v534_v35 = vpop.f32.mrf.mxu0  ;;  %v662_v36 = vpop.f32.mrf.mxu1  ;;  %vm799_vm1 = vcmp.gt.f32.partialorder %v1793_v27, 0.0 }
  0xff   : > { %1682 = vst [vmem:[%s1981_s6 + $0x98] sm:$0xff] %v1602_v28   ;;  %v1597_v37 = vpack.c.bf16 %v922_v33, %v921_v31  ;;  %v895_v38 = vsel %vm767_vm0, %v1761_v26, %v831_v30  ;;  %v829_v39 = vmul.f32 0.2, %v534_v35  ;;  %vm765_vm2 = vcmp.gt.f32.partialorder %v534_v35, 0.0 }
 0x100   : > { %1665 = vst [vmem:[%s1981_s6 + $0x10] sm:$0xff] %v1517_v32   ;;  %v1762_v40 = vpop.f32.mrf.mxu0  ;;  %v1794_v41 = vpop.f32.mrf.mxu1  ;;  %v927_v43 = vsel %vm799_vm1, %v1793_v27, %v863_v34  ;;  %vm797_vm5 = vcmp.gt.f32.partialorder %v662_v36, 0.0  ;;  %v861_v44 = vmul.f32 0.2, %v662_v36 }
 0x101   : > { %1681 = vst [vmem:[%s1981_s6 + $0x90] sm:$0xff] %v1597_v37   ;;  %vm768_vm3 = vcmp.gt.f32.partialorder %v1762_v40, 0.0  ;;  %v832_v42 = vmul.f32 0.2, %v1762_v40  ;;  %vm800_vm4 = vcmp.gt.f32.partialorder %v1794_v41, 0.0  ;;  %v893_v50 = vsel %vm765_vm2, %v534_v35, %v829_v39 }
 0x102   : > { %v864_v45 = vmul.f32 0.2, %v1794_v41  ;;  %v537_v46 = vpop.f32.mrf.mxu0  ;;  %v665_v47 = vpop.f32.mrf.mxu1  ;;  %v925_v59 = vsel %vm797_vm5, %v662_v36, %v861_v44 }
 0x103   : > { %v896_v48 = vsel %vm768_vm3, %v1762_v40, %v832_v42  ;;  %vm766_vm6 = vcmp.gt.f32.partialorder %v537_v46, 0.0  ;;  %v830_v49 = vmul.f32 0.2, %v537_v46  ;;  %vm798_vm7 = vcmp.gt.f32.partialorder %v665_v47, 0.0 }
 0x104   : > { %v1532_v51 = vpack.c.bf16 %v896_v48, %v895_v38  ;;  %v928_v52 = vsel %vm800_vm4, %v1794_v41, %v864_v45  ;;  %v862_v53 = vmul.f32 0.2, %v665_v47  ;;  %v1765_v54 = vpop.f32.mrf.mxu0  ;;  %v1797_v55 = vpop.f32.mrf.mxu1 }
 0x105   : > { %v1612_v56 = vpack.c.bf16 %v928_v52, %v927_v43  ;;  %v894_v57 = vsel %vm766_vm6, %v537_v46, %v830_v49  ;;  %vm771_vm8 = vcmp.gt.f32.partialorder %v1765_v54, 0.0  ;;  %v835_v58 = vmul.f32 0.2, %v1765_v54 }
 0x106   : > { %1668 = vst [vmem:[%s1981_s6 + $0x28] sm:$0xff] %v1532_v51   ;;  %v1527_v60 = vpack.c.bf16 %v894_v57, %v893_v50  ;;  %v926_v61 = vsel %vm798_vm7, %v665_v47, %v862_v53  ;;  %v867_v62 = vmul.f32 0.2, %v1797_v55  ;;  %v550_v63 = vpop.f32.mrf.mxu0  ;;  %v678_v0 = vpop.f32.mrf.mxu1  ;;  %vm803_vm9 = vcmp.gt.f32.partialorder %v1797_v55, 0.0 }
 0x107   : > { %1684 = vst [vmem:[%s1981_s6 + $0xa8] sm:$0xff] %v1612_v56   ;;  %v1607_v1 = vpack.c.bf16 %v926_v61, %v925_v59  ;;  %v899_v2 = vsel %vm771_vm8, %v1765_v54, %v835_v58  ;;  %v833_v3 = vmul.f32 0.2, %v550_v63  ;;  %vm769_vm10 = vcmp.gt.f32.partialorder %v550_v63, 0.0 }
 0x108   : > { %1667 = vst [vmem:[%s1981_s6 + $0x20] sm:$0xff] %v1527_v60   ;;  %v1766_v4 = vpop.f32.mrf.mxu0  ;;  %v1798_v5 = vpop.f32.mrf.mxu1  ;;  %v931_v7 = vsel %vm803_vm9, %v1797_v55, %v867_v62  ;;  %vm801_vm13 = vcmp.gt.f32.partialorder %v678_v0, 0.0  ;;  %v865_v8 = vmul.f32 0.2, %v678_v0 }
 0x109   : > { %1683 = vst [vmem:[%s1981_s6 + $0xa0] sm:$0xff] %v1607_v1   ;;  %vm772_vm11 = vcmp.gt.f32.partialorder %v1766_v4, 0.0  ;;  %v836_v6 = vmul.f32 0.2, %v1766_v4  ;;  %vm804_vm12 = vcmp.gt.f32.partialorder %v1798_v5, 0.0  ;;  %v897_v14 = vsel %vm769_vm10, %v550_v63, %v833_v3 }
 0x10a   : > { %v868_v9 = vmul.f32 0.2, %v1798_v5  ;;  %v553_v10 = vpop.f32.mrf.mxu0  ;;  %v681_v11 = vpop.f32.mrf.mxu1  ;;  %v929_v23 = vsel %vm801_vm13, %v678_v0, %v865_v8 }
 0x10b   : > { %v900_v12 = vsel %vm772_vm11, %v1766_v4, %v836_v6  ;;  %vm770_vm14 = vcmp.gt.f32.partialorder %v553_v10, 0.0  ;;  %v834_v13 = vmul.f32 0.2, %v553_v10  ;;  %vm802_vm15 = vcmp.gt.f32.partialorder %v681_v11, 0.0 }
 0x10c   : > { %v1542_v15 = vpack.c.bf16 %v900_v12, %v899_v2  ;;  %v932_v16 = vsel %vm804_vm12, %v1798_v5, %v868_v9  ;;  %v866_v17 = vmul.f32 0.2, %v681_v11  ;;  %v1769_v18 = vpop.f32.mrf.mxu0  ;;  %v1801_v19 = vpop.f32.mrf.mxu1 }
 0x10d   : > { %v1622_v20 = vpack.c.bf16 %v932_v16, %v931_v7  ;;  %v898_v21 = vsel %vm770_vm14, %v553_v10, %v834_v13  ;;  %vm775_vm0 = vcmp.gt.f32.partialorder %v1769_v18, 0.0  ;;  %v839_v22 = vmul.f32 0.2, %v1769_v18 }
 0x10e   : > { %1670 = vst [vmem:[%s1981_s6 + $0x38] sm:$0xff] %v1542_v15   ;;  %v1537_v24 = vpack.c.bf16 %v898_v21, %v897_v14  ;;  %v930_v25 = vsel %vm802_vm15, %v681_v11, %v866_v17  ;;  %v871_v26 = vmul.f32 0.2, %v1801_v19  ;;  %v566_v27 = vpop.f32.mrf.mxu0  ;;  %v694_v28 = vpop.f32.mrf.mxu1  ;;  %vm807_vm1 = vcmp.gt.f32.partialorder %v1801_v19, 0.0 }
 0x10f   : > { %1686 = vst [vmem:[%s1981_s6 + $0xb8] sm:$0xff] %v1622_v20   ;;  %v1617_v29 = vpack.c.bf16 %v930_v25, %v929_v23  ;;  %v903_v30 = vsel %vm775_vm0, %v1769_v18, %v839_v22  ;;  %v837_v31 = vmul.f32 0.2, %v566_v27  ;;  %vm773_vm2 = vcmp.gt.f32.partialorder %v566_v27, 0.0 }
 0x110   : > { %1669 = vst [vmem:[%s1981_s6 + $0x30] sm:$0xff] %v1537_v24   ;;  %v1770_v32 = vpop.f32.mrf.mxu0  ;;  %v1802_v33 = vpop.f32.mrf.mxu1  ;;  %v935_v35 = vsel %vm807_vm1, %v1801_v19, %v871_v26  ;;  %vm805_vm5 = vcmp.gt.f32.partialorder %v694_v28, 0.0  ;;  %v869_v36 = vmul.f32 0.2, %v694_v28 }
 0x111   : > { %1685 = vst [vmem:[%s1981_s6 + $0xb0] sm:$0xff] %v1617_v29   ;;  %vm776_vm3 = vcmp.gt.f32.partialorder %v1770_v32, 0.0  ;;  %v840_v34 = vmul.f32 0.2, %v1770_v32  ;;  %vm808_vm4 = vcmp.gt.f32.partialorder %v1802_v33, 0.0  ;;  %v901_v42 = vsel %vm773_vm2, %v566_v27, %v837_v31 }
 0x112   : > { %v872_v37 = vmul.f32 0.2, %v1802_v33  ;;  %v569_v38 = vpop.f32.mrf.mxu0  ;;  %v697_v39 = vpop.f32.mrf.mxu1  ;;  %v933_v51 = vsel %vm805_vm5, %v694_v28, %v869_v36 }
 0x113   : > { %v904_v40 = vsel %vm776_vm3, %v1770_v32, %v840_v34  ;;  %vm774_vm6 = vcmp.gt.f32.partialorder %v569_v38, 0.0  ;;  %v838_v41 = vmul.f32 0.2, %v569_v38  ;;  %vm806_vm7 = vcmp.gt.f32.partialorder %v697_v39, 0.0 }
 0x114   : > { %v1552_v43 = vpack.c.bf16 %v904_v40, %v903_v30  ;;  %v936_v44 = vsel %vm808_vm4, %v1802_v33, %v872_v37  ;;  %v870_v45 = vmul.f32 0.2, %v697_v39  ;;  %v1773_v46 = vpop.f32.mrf.mxu0  ;;  %v1805_v47 = vpop.f32.mrf.mxu1 }
 0x115   : > { %v1632_v48 = vpack.c.bf16 %v936_v44, %v935_v35  ;;  %v902_v49 = vsel %vm774_vm6, %v569_v38, %v838_v41  ;;  %vm779_vm8 = vcmp.gt.f32.partialorder %v1773_v46, 0.0  ;;  %v843_v50 = vmul.f32 0.2, %v1773_v46 }
 0x116   : > { %1672 = vst [vmem:[%s1981_s6 + $0x48] sm:$0xff] %v1552_v43   ;;  %v1547_v52 = vpack.c.bf16 %v902_v49, %v901_v42  ;;  %v934_v53 = vsel %vm806_vm7, %v697_v39, %v870_v45  ;;  %v875_v54 = vmul.f32 0.2, %v1805_v47  ;;  %v582_v55 = vpop.f32.mrf.mxu0  ;;  %v710_v56 = vpop.f32.mrf.mxu1  ;;  %vm811_vm9 = vcmp.gt.f32.partialorder %v1805_v47, 0.0 }
 0x117   : > { %1688 = vst [vmem:[%s1981_s6 + $0xc8] sm:$0xff] %v1632_v48   ;;  %v1627_v57 = vpack.c.bf16 %v934_v53, %v933_v51  ;;  %v907_v58 = vsel %vm779_vm8, %v1773_v46, %v843_v50  ;;  %v841_v59 = vmul.f32 0.2, %v582_v55  ;;  %vm777_vm10 = vcmp.gt.f32.partialorder %v582_v55, 0.0 }
 0x118   : > { %1671 = vst [vmem:[%s1981_s6 + $0x40] sm:$0xff] %v1547_v52   ;;  %v1774_v60 = vpop.f32.mrf.mxu0  ;;  %v1806_v61 = vpop.f32.mrf.mxu1  ;;  %v939_v63 = vsel %vm811_vm9, %v1805_v47, %v875_v54  ;;  %vm809_vm13 = vcmp.gt.f32.partialorder %v710_v56, 0.0  ;;  %v873_v0 = vmul.f32 0.2, %v710_v56 }
 0x119   : > { %1687 = vst [vmem:[%s1981_s6 + $0xc0] sm:$0xff] %v1627_v57   ;;  %vm780_vm11 = vcmp.gt.f32.partialorder %v1774_v60, 0.0  ;;  %v844_v62 = vmul.f32 0.2, %v1774_v60  ;;  %vm812_vm12 = vcmp.gt.f32.partialorder %v1806_v61, 0.0  ;;  %v905_v6 = vsel %vm777_vm10, %v582_v55, %v841_v59 }
 0x11a   : > { %v876_v1 = vmul.f32 0.2, %v1806_v61  ;;  %v585_v2 = vpop.f32.mrf.mxu0  ;;  %v713_v3 = vpop.f32.mrf.mxu1  ;;  %v937_v15 = vsel %vm809_vm13, %v710_v56, %v873_v0 }
 0x11b   : > { %v908_v4 = vsel %vm780_vm11, %v1774_v60, %v844_v62  ;;  %vm778_vm14 = vcmp.gt.f32.partialorder %v585_v2, 0.0  ;;  %v842_v5 = vmul.f32 0.2, %v585_v2  ;;  %vm810_vm15 = vcmp.gt.f32.partialorder %v713_v3, 0.0 }
 0x11c   : > { %v1562_v7 = vpack.c.bf16 %v908_v4, %v907_v58  ;;  %v940_v8 = vsel %vm812_vm12, %v1806_v61, %v876_v1  ;;  %v874_v9 = vmul.f32 0.2, %v713_v3  ;;  %v1777_v10 = vpop.f32.mrf.mxu0  ;;  %v1809_v11 = vpop.f32.mrf.mxu1 }
 0x11d   : > { %v1642_v12 = vpack.c.bf16 %v940_v8, %v939_v63  ;;  %v906_v13 = vsel %vm778_vm14, %v585_v2, %v842_v5  ;;  %vm783_vm0 = vcmp.gt.f32.partialorder %v1777_v10, 0.0  ;;  %v847_v14 = vmul.f32 0.2, %v1777_v10 }
 0x11e   : > { %1674 = vst [vmem:[%s1981_s6 + $0x58] sm:$0xff] %v1562_v7   ;;  %v1557_v16 = vpack.c.bf16 %v906_v13, %v905_v6  ;;  %v938_v17 = vsel %vm810_vm15, %v713_v3, %v874_v9  ;;  %v879_v18 = vmul.f32 0.2, %v1809_v11  ;;  %v598_v19 = vpop.f32.mrf.mxu0  ;;  %v726_v20 = vpop.f32.mrf.mxu1  ;;  %vm815_vm1 = vcmp.gt.f32.partialorder %v1809_v11, 0.0 }
 0x11f   : > { %1690 = vst [vmem:[%s1981_s6 + $0xd8] sm:$0xff] %v1642_v12   ;;  %v1637_v21 = vpack.c.bf16 %v938_v17, %v937_v15  ;;  %v911_v22 = vsel %vm783_vm0, %v1777_v10, %v847_v14  ;;  %v845_v23 = vmul.f32 0.2, %v598_v19  ;;  %vm781_vm2 = vcmp.gt.f32.partialorder %v598_v19, 0.0 }
 0x120   : > { %1673 = vst [vmem:[%s1981_s6 + $0x50] sm:$0xff] %v1557_v16   ;;  %v1778_v24 = vpop.f32.mrf.mxu0  ;;  %v1810_v25 = vpop.f32.mrf.mxu1  ;;  %v943_v27 = vsel %vm815_vm1, %v1809_v11, %v879_v18  ;;  %vm813_vm5 = vcmp.gt.f32.partialorder %v726_v20, 0.0  ;;  %v877_v28 = vmul.f32 0.2, %v726_v20 }
 0x121   : > { %1689 = vst [vmem:[%s1981_s6 + $0xd0] sm:$0xff] %v1637_v21   ;;  %vm784_vm3 = vcmp.gt.f32.partialorder %v1778_v24, 0.0  ;;  %v848_v26 = vmul.f32 0.2, %v1778_v24  ;;  %vm816_vm4 = vcmp.gt.f32.partialorder %v1810_v25, 0.0  ;;  %v909_v34 = vsel %vm781_vm2, %v598_v19, %v845_v23 }
 0x122   : > { %v880_v29 = vmul.f32 0.2, %v1810_v25  ;;  %v601_v30 = vpop.f32.mrf.mxu0  ;;  %v729_v31 = vpop.f32.mrf.mxu1  ;;  %v941_v43 = vsel %vm813_vm5, %v726_v20, %v877_v28 }
 0x123   : > { %v912_v32 = vsel %vm784_vm3, %v1778_v24, %v848_v26  ;;  %vm782_vm6 = vcmp.gt.f32.partialorder %v601_v30, 0.0  ;;  %v846_v33 = vmul.f32 0.2, %v601_v30  ;;  %vm814_vm7 = vcmp.gt.f32.partialorder %v729_v31, 0.0 }
 0x124   : > { %v1572_v35 = vpack.c.bf16 %v912_v32, %v911_v22  ;;  %v944_v36 = vsel %vm816_vm4, %v1810_v25, %v880_v29  ;;  %v878_v37 = vmul.f32 0.2, %v729_v31  ;;  %v1781_v38 = vpop.f32.mrf.mxu0  ;;  %v1813_v39 = vpop.f32.mrf.mxu1 }
 0x125   : > { %v1652_v40 = vpack.c.bf16 %v944_v36, %v943_v27  ;;  %v910_v41 = vsel %vm782_vm6, %v601_v30, %v846_v33  ;;  %vm787_vm8 = vcmp.gt.f32.partialorder %v1781_v38, 0.0  ;;  %v851_v42 = vmul.f32 0.2, %v1781_v38 }
 0x126   : > { %1676 = vst [vmem:[%s1981_s6 + $0x68] sm:$0xff] %v1572_v35   ;;  %v1567_v44 = vpack.c.bf16 %v910_v41, %v909_v34  ;;  %v942_v45 = vsel %vm814_vm7, %v729_v31, %v878_v37  ;;  %v614_v46 = vpop.f32.mrf.mxu0  ;;  %v742_v47 = vpop.f32.mrf.mxu1  ;;  %vm819_vm9 = vcmp.gt.f32.partialorder %v1813_v39, 0.0  ;;  %v883_v50 = vmul.f32 0.2, %v1813_v39 }
 0x127   : > { %1692 = vst [vmem:[%s1981_s6 + $0xe8] sm:$0xff] %v1652_v40   ;;  %v1647_v48 = vpack.c.bf16 %v942_v45, %v941_v43  ;;  %v915_v49 = vsel %vm787_vm8, %v1781_v38, %v851_v42  ;;  %v849_v53 = vmul.f32 0.2, %v614_v46  ;;  %vm785_vm12 = vcmp.gt.f32.partialorder %v614_v46, 0.0 }
 0x128   : > { %1675 = vst [vmem:[%s1981_s6 + $0x60] sm:$0xff] %v1567_v44   ;;  %v1782_v51 = vpop.f32.mrf.mxu0  ;;  %v1814_v52 = vpop.f32.mrf.mxu1  ;;  %vm817_vm13 = vcmp.gt.f32.partialorder %v742_v47, 0.0  ;;  %v881_v55 = vmul.f32 0.2, %v742_v47  ;;  %v947_v61 = vsel %vm819_vm9, %v1813_v39, %v883_v50 }
 0x129   : > { %1691 = vst [vmem:[%s1981_s6 + $0xe0] sm:$0xff] %v1647_v48   ;;  %vm788_vm10 = vcmp.gt.f32.partialorder %v1782_v51, 0.0  ;;  %v852_v54 = vmul.f32 0.2, %v1782_v51  ;;  %vm820_vm11 = vcmp.gt.f32.partialorder %v1814_v52, 0.0  ;;  %v913_v1 = vsel %vm785_vm12, %v614_v46, %v849_v53 }
 0x12a   : > { %v884_v56 = vmul.f32 0.2, %v1814_v52  ;;  %v617_v57 = vpop.f32.mrf.mxu0  ;;  %v745_v58 = vpop.f32.mrf.mxu1  ;;  %v945_v4 = vsel %vm817_vm13, %v742_v47, %v881_v55 }
 0x12b   : > { %v916_v59 = vsel %vm788_vm10, %v1782_v51, %v852_v54  ;;  %vm786_vm14 = vcmp.gt.f32.partialorder %v617_v57, 0.0  ;;  %v850_v60 = vmul.f32 0.2, %v617_v57  ;;  %vm818_vm15 = vcmp.gt.f32.partialorder %v745_v58, 0.0 }
 0x12c   : > { %v1582_v62 = vpack.c.bf16 %v916_v59, %v915_v49  ;;  %v948_v63 = vsel %vm820_vm11, %v1814_v52, %v884_v56  ;;  %v882_v0 = vmul.f32 0.2, %v745_v58 }
 0x12d   : > { %v1662_v2 = vpack.c.bf16 %v948_v63, %v947_v61  ;;  %v914_v3 = vsel %vm786_vm14, %v617_v57, %v850_v60 }
 0x12e   : > { %1678 = vst [vmem:[%s1981_s6 + $0x78] sm:$0xff] %v1582_v62   ;;  %v1577_v5 = vpack.c.bf16 %v914_v3, %v913_v1  ;;  %v946_v6 = vsel %vm818_vm15, %v745_v58, %v882_v0 }
 0x12f   : > { %1694 = vst [vmem:[%s1981_s6 + $0xf8] sm:$0xff] %v1662_v2   ;;  %v1657_v7 = vpack.c.bf16 %v946_v6, %v945_v4 }
 0x130   : > { %1677 = vst [vmem:[%s1981_s6 + $0x70] sm:$0xff] %v1577_v5  }
 0x131   : > { %1693 = vst [vmem:[%s1981_s6 + $0xf0] sm:$0xff] %v1657_v7  }
 0x132 PF: > { %s12_s9 = sadd.s32 1, %s1885_s9  }
 0x133   : > { %p9_p4 = scmp.ge.s32.totalorder %s12_s9, 6  }
 0x135   :  { %11 = sbr.rel (!%p9_p4) target bundleno = 1 (0x1), region = 58 }

// kernel: discriminator_forward.7
= control target key start
LH: loop header
LB: loop body
LE: loop exit
PB: predicated region body
PF: predicated region fallthrough
CT: control target
= control target key end

     0   :  { %s792_s15 = smov 0   ;;  %s876_s0 = inlined_call_operand.vmem [shape: bf16[512,128], index: 0, kind: input, shape index: {}]   ;;  %s877_s1 = inlined_call_operand.vmem [shape: bf16[128,128], index: 1, kind: input, shape index: {}]   ;;  %s878_s2 = inlined_call_operand.vmem [shape: f32[512,128], index: 2, kind: output, shape index: {0}]   ;;  %s879_s3 = inlined_call_operand.vmem [shape: f32[4,8,128], index: 3, kind: output, shape index: {1}]   ;;  %s880_s4 = inlined_call_operand.vmem [shape: f32[4,8,128], index: 4, kind: output, shape index: {2}]  }
   0x1 LB: > { %s798_s16 = sadd.s32 4294967295, %s765_s15   ;;  %p646_p0 = scmp.ge.s32.totalorder %s765_s15, 1  ;;  %s765_s15 = sphi %s792_s15, %s15_s15  }
   0x2   : > { %p168_p1 = scmp.lt.s32.totalorder %s765_s15, 5 }
   0x4   : > { %p169_p2 = pnand %p646_p0, %p168_p1 }
   0x5   : > { %s647_s19 = sshll.u32 (!%p169_p2), %s798_s16, 4  ;;  %p214_p4 = scmp.lt.s32.totalorder (!%p169_p2), %s798_s16, 3 }
   0x6   : > { %172 = sbr.rel (%p169_p2) target bundleno = 288 (0x120), region = 28  ;;  %p203_p3 = scmp.lt.s32.totalorder (!%p169_p2), %s647_s19, 63 }
   0xb   : > { %v743_v0 = vld [vmem:[%s877_s1 + $0x38] sm:$0xff]   ;;  %v744_v1 = vld [vmem:[%s877_s1 + $0x30] sm:$0xff]   ;;  %s882_s19 = smov (!%p203_p3, %s647_s19), 63  ;;  %v745_v2 = vld [vmem:[%s877_s1 + $0x28] sm:$0xff]   ;;  %s884_s16 = smov (!%p214_p4, %s798_s16), 3 }
   0xc   : > { %687 = vmatprep.subr.bf16.mxu0 %v743_v0  ;;  %719 = vmatprep.subr.bf16.mxu1 %v743_v0  ;;  %s648_s24 = sshll.u32 %s882_s19, 2  ;;  %v746_v3 = vld [vmem:[%s877_s1 + $0x20] sm:$0xff]   ;;  %v747_v5 = vld [vmem:[%s877_s1 + $0x18] sm:$0xff]   ;;  %v748_v7 = vld [vmem:[%s877_s1 + $0x10] sm:$0xff]   ;;  %s650_s12 = sshll.u32 %s882_s19, 3 }
   0xd   : > { %688 = vmatpush3.bf16.msra.mxu0 %v743_v0  ;;  %727 = vmatpush3.bf16.msra.mxu1 %v743_v0  ;;  %s818_s27 = scalar_lea.vmem %s876_s0, %s648_s24  ;;  %v749_v8 = vld [vmem:[%s877_s1 + $0x8] sm:$0xff]   ;;  %v750_v9 = vld [vmem:[%s877_s1] sm:$0xff]   ;;  %s847_s17 = scalar_lea.vmem %s878_s2, %s650_s12 }
   0xe   : > { %689 = vmatprep.subr.bf16.mxu0 %v744_v1  ;;  %720 = vmatprep.subr.bf16.mxu1 %v744_v1  ;;  %v751_v4 = vld [vmem:[%s818_s27] sm:$0xff]   ;;  %v752_v10 = vld [vmem:[%s818_s27 + $0x8] sm:$0xff]   ;;  %v753_v12 = vld [vmem:[%s818_s27 + $0x10] sm:$0xff]   ;;  %s651_s18 = sshll.u32 %s884_s16, 3 }
   0xf   : > { %703 = vmatprep.mubr.bf16.mxu0 %v751_v4  ;;  %v755_v6 = vld [vmem:[%s818_s27 + $0x20] sm:$0xff]   ;;  %v756_v11 = vld [vmem:[%s818_s27 + $0x28] sm:$0xff]   ;;  %v757_v13 = vld [vmem:[%s818_s27 + $0x30] sm:$0xff]   ;;  %s217_s21 = scalar_lea.vmem %s879_s3, %s651_s18  ;;  %s221_s24 = scalar_lea.vmem %s880_s4, %s651_s18 }
  0x10   : > { %711 = vmatprep.mubr.bf16.mxu1 %v755_v6  ;;  %v754_v14 = vld [vmem:[%s818_s27 + $0x18] sm:$0xff]  }
  0x11   : > { %690 = vmatpush3.bf16.msra.mxu0 %v744_v1  ;;  %728 = vmatpush3.bf16.msra.mxu1 %v744_v1  ;;  %v758_v15 = vld [vmem:[%s818_s27 + $0x38] sm:$0xff]  }
  0x12   : > { %691 = vmatprep.subr.bf16.mxu0 %v745_v2  ;;  %721 = vmatprep.subr.bf16.mxu1 %v745_v2 }
  0x15   : > { %692 = vmatpush3.bf16.msra.mxu0 %v745_v2  ;;  %729 = vmatpush3.bf16.msra.mxu1 %v745_v2 }
  0x16   : > { %693 = vmatprep.subr.bf16.mxu0 %v746_v3  ;;  %722 = vmatprep.subr.bf16.mxu1 %v746_v3 }
  0x19   : > { %694 = vmatpush3.bf16.msra.mxu0 %v746_v3  ;;  %730 = vmatpush3.bf16.msra.mxu1 %v746_v3 }
  0x1a   : > { %695 = vmatprep.subr.bf16.mxu0 %v747_v5  ;;  %723 = vmatprep.subr.bf16.mxu1 %v747_v5 }
  0x1d   : > { %696 = vmatpush3.bf16.msra.mxu0 %v747_v5  ;;  %731 = vmatpush3.bf16.msra.mxu1 %v747_v5 }
  0x1e   : > { %697 = vmatprep.subr.bf16.mxu0 %v748_v7  ;;  %724 = vmatprep.subr.bf16.mxu1 %v748_v7 }
  0x21   : > { %698 = vmatpush3.bf16.msra.mxu0 %v748_v7  ;;  %732 = vmatpush3.bf16.msra.mxu1 %v748_v7 }
  0x22   : > { %699 = vmatprep.subr.bf16.mxu0 %v749_v8  ;;  %725 = vmatprep.subr.bf16.mxu1 %v749_v8 }
  0x25   : > { %700 = vmatpush3.bf16.msra.mxu0 %v749_v8  ;;  %733 = vmatpush3.bf16.msra.mxu1 %v749_v8 }
  0x26   : > { %701 = vmatprep.subr.bf16.mxu0 %v750_v9  ;;  %726 = vmatprep.subr.bf16.mxu1 %v750_v9 }
  0x29   : > { %702 = vmatpush3.bf16.msra.mxu0 %v750_v9  ;;  %734 = vmatpush3.bf16.msra.mxu1 %v750_v9 }
  0x2c   : > { %704 = vmatmul.mubr.bf16.vlgmr.msra.gmra.mxu0 %v752_v10  ;;  %712 = vmatmul.mubr.bf16.vlgmr.msra.gmra.mxu1 %v756_v11 }
  0x2d   : > { %707 = vmatprep.mubr.bf16.mxu0 %v753_v12  ;;  %715 = vmatprep.mubr.bf16.mxu1 %v757_v13 }
  0x34   : > { %708 = vmatmul.mubr.bf16.gmra.mxu0 %v754_v14  ;;  %716 = vmatmul.mubr.bf16.gmra.mxu1 %v758_v15 }
  0xec   : > { %v705_v16 = vpop.f32.mrf.mxu0  ;;  %v713_v17 = vpop.f32.mrf.mxu1 }
  0xed   : > { %510 = vst [vmem:[%s847_s17 + $0x10] sm:$0xff] %v705_v16  ;;  %518 = vst [vmem:[%s847_s17 + $0x50] sm:$0xff] %v713_v17  ;;  %v471_v29 = vmul.f32 %v705_v16, %v705_v16  ;;  %v479_v59 = vmul.f32 %v713_v17, %v713_v17 }
  0xee   : > { %v385_v18 = vpop.f32.mrf.mxu0  ;;  %v417_v19 = vpop.f32.mrf.mxu1 }
  0xef   : > { %508 = vst [vmem:[%s847_s17] sm:$0xff] %v385_v18  ;;  %516 = vst [vmem:[%s847_s17 + $0x40] sm:$0xff] %v417_v19  ;;  %v469_v24 = vmul.f32 %v385_v18, %v385_v18  ;;  %v477_v53 = vmul.f32 %v417_v19, %v417_v19 }
  0xf0   : > { %v706_v20 = vpop.f32.mrf.mxu0  ;;  %v714_v21 = vpop.f32.mrf.mxu1 }
  0xf1   : > { %511 = vst [vmem:[%s847_s17 + $0x18] sm:$0xff] %v706_v20  ;;  %519 = vst [vmem:[%s847_s17 + $0x58] sm:$0xff] %v714_v21  ;;  %v472_v34 = vmul.f32 %v706_v20, %v706_v20  ;;  %v480_v62 = vmul.f32 %v714_v21, %v714_v21 }
  0xf2   : > { %v388_v22 = vpop.f32.mrf.mxu0  ;;  %v420_v23 = vpop.f32.mrf.mxu1 }
  0xf3   : > { %v448_v25 = vadd.f32 %v388_v22, %v385_v18  ;;  %v470_v26 = vmul.f32 %v388_v22, %v388_v22  ;;  %509 = vst [vmem:[%s847_s17 + $0x8] sm:$0xff] %v388_v22  ;;  %517 = vst [vmem:[%s847_s17 + $0x48] sm:$0xff] %v420_v23  ;;  %v478_v57 = vmul.f32 %v420_v23, %v420_v23 }
  0xf4   : > { %v709_v27 = vpop.f32.mrf.mxu0  ;;  %v717_v28 = vpop.f32.mrf.mxu1 }
  0xf5   : > { %v449_v30 = vadd.f32 %v705_v16, %v448_v25  ;;  %v485_v31 = vadd.f32 %v470_v26, %v469_v24  ;;  %514 = vst [vmem:[%s847_s17 + $0x30] sm:$0xff] %v709_v27  ;;  %522 = vst [vmem:[%s847_s17 + $0x70] sm:$0xff] %v717_v28  ;;  %v475_v47 = vmul.f32 %v709_v27, %v709_v27 }
  0xf6   : > { %v401_v32 = vpop.f32.mrf.mxu0  ;;  %v433_v33 = vpop.f32.mrf.mxu1  ;;  %v483_v7 = vmul.f32 %v717_v28, %v717_v28 }
  0xf7   : > { %v486_v35 = vadd.f32 %v485_v31, %v471_v29  ;;  %v450_v36 = vadd.f32 %v706_v20, %v449_v30  ;;  %512 = vst [vmem:[%s847_s17 + $0x20] sm:$0xff] %v401_v32  ;;  %520 = vst [vmem:[%s847_s17 + $0x60] sm:$0xff] %v433_v33  ;;  %v473_v40 = vmul.f32 %v401_v32, %v401_v32 }
  0xf8   : > { %v710_v37 = vpop.f32.mrf.mxu0  ;;  %v718_v38 = vpop.f32.mrf.mxu1  ;;  %v481_v2 = vmul.f32 %v433_v33, %v433_v33 }
  0xf9   : > { %v451_v39 = vadd.f32 %v450_v36, %v401_v32  ;;  %v487_v41 = vadd.f32 %v486_v35, %v472_v34  ;;  %515 = vst [vmem:[%s847_s17 + $0x38] sm:$0xff] %v710_v37  ;;  %523 = vst [vmem:[%s847_s17 + $0x78] sm:$0xff] %v718_v38  ;;  %v476_v50 = vmul.f32 %v710_v37, %v710_v37 }
  0xfa   : > { %v404_v42 = vpop.f32.mrf.mxu0  ;;  %v436_v43 = vpop.f32.mrf.mxu1  ;;  %v484_v10 = vmul.f32 %v718_v38, %v718_v38 }
  0xfb   : > { %v488_v44 = vadd.f32 %v487_v41, %v473_v40  ;;  %v452_v45 = vadd.f32 %v451_v39, %v404_v42  ;;  %v474_v46 = vmul.f32 %v404_v42, %v404_v42  ;;  %513 = vst [vmem:[%s847_s17 + $0x28] sm:$0xff] %v404_v42  ;;  %521 = vst [vmem:[%s847_s17 + $0x68] sm:$0xff] %v436_v43 }
  0xfc   : > { %v482_v6 = vmul.f32 %v436_v43, %v436_v43 }
  0xfd   : > { %v453_v48 = vadd.f32 %v709_v27, %v452_v45  ;;  %v489_v49 = vadd.f32 %v488_v44, %v474_v46 }
  0xff   : > { %v454_v51 = vadd.f32 %v710_v37, %v453_v48  ;;  %v490_v52 = vadd.f32 %v489_v49, %v475_v47 }
 0x101   : > { %v491_v54 = vadd.f32 %v490_v52, %v476_v50  ;;  %v455_v55 = vadd.f32 %v454_v51, %v417_v19 }
 0x103   : > { %v456_v56 = vadd.f32 %v455_v55, %v420_v23  ;;  %v492_v58 = vadd.f32 %v491_v54, %v477_v53 }
 0x105   : > { %v457_v60 = vadd.f32 %v713_v17, %v456_v56  ;;  %v493_v61 = vadd.f32 %v492_v58, %v478_v57 }
 0x107   : > { %v494_v63 = vadd.f32 %v493_v61, %v479_v59  ;;  %v458_v0 = vadd.f32 %v714_v21, %v457_v60 }
 0x109   : > { %v459_v1 = vadd.f32 %v458_v0, %v433_v33  ;;  %v495_v3 = vadd.f32 %v494_v63, %v480_v62 }
 0x10b   : > { %v496_v4 = vadd.f32 %v495_v3, %v481_v2  ;;  %v460_v5 = vadd.f32 %v459_v1, %v436_v43 }
 0x10d   : > { %v461_v8 = vadd.f32 %v717_v28, %v460_v5  ;;  %v497_v9 = vadd.f32 %v496_v4, %v482_v6 }
 0x10f   : > { %v462_v11 = vadd.f32 %v718_v38, %v461_v8  ;;  %v498_v12 = vadd.f32 %v497_v9, %v483_v7 }
 0x111   : > { %v463_v13 = vrot.slane %v462_v11, 4  ;;  %v499_v14 = vadd.f32 %v498_v12, %v484_v10 }
 0x113   : > { %v464_v15 = vadd.f32 %v463_v13, %v462_v11  ;;  %v500_v16 = vrot.slane %v499_v14, 4 }
 0x115   : > { %v465_v17 = vrot.slane %v464_v15, 2  ;;  %v501_v18 = vadd.f32 %v500_v16, %v499_v14 }
 0x117   : > { %v466_v19 = vadd.f32 %v465_v17, %v464_v15  ;;  %v502_v20 = vrot.slane %v501_v18, 2 }
 0x119   : > { %v467_v21 = vrot.slane %v466_v19, 1  ;;  %v503_v22 = vadd.f32 %v502_v20, %v501_v18 }
 0x11b   : > { %v468_v23 = vadd.f32 %v467_v21, %v466_v19  ;;  %v504_v24 = vrot.slane %v503_v22, 1 }
 0x11d   : > { %v505_v25 = vadd.f32 %v504_v24, %v503_v22  ;;  %506 = vst [vmem:[%s217_s21] sm:$0xff] %v468_v23 }
 0x11f   : > { %507 = vst [vmem:[%s221_s24] sm:$0xff] %v505_v25 }
 0x120 PF: > { %s15_s15 = sadd.s32 1, %s765_s15  }
 0x121   : > { %p12_p5 = scmp.ge.s32.totalorder %s15_s15, 6  }
 0x123   :  { %14 = sbr.rel (!%p12_p5) target bundleno = 1 (0x1), region = 82 }

// kernel: discriminator_forward.8
= control target key start
LH: loop header
LB: loop body
LE: loop exit
PB: predicated region body
PF: predicated region fallthrough
CT: control target
= control target key end

     0   :  { %s548_s12 = smov 0   ;;  %s640_s0 = inlined_call_operand.vmem [shape: f32[1,128], index: 0, kind: input, shape index: {}]   ;;  %s641_s1 = inlined_call_operand.vmem [shape: f32[1,128], index: 1, kind: input, shape index: {}]   ;;  %s642_s2 = inlined_call_operand.vmem [shape: f32[512,128], index: 2, kind: input, shape index: {}]   ;;  %s643_s3 = inlined_call_operand.vmem [shape: bf16[512,128], index: 3, kind: output, shape index: {}]  }
   0x1 LB: > { %s420_s13 = sadd.s32 4294967295, %s526_s12   ;;  %p424_p0 = scmp.ge.s32.totalorder %s526_s12, 1  ;;  %s526_s12 = sphi %s548_s12, %s13_s12  }
   0x2   : > { %p138_p1 = scmp.lt.s32.totalorder %s526_s12, 5 }
   0x4   : > { %p139_p2 = pnand %p424_p0, %p138_p1 }
   0x5   : > { %s425_s14 = sshll.u32 (!%p139_p2), %s420_s13, 4 }
   0x6   : > { %142 = sbr.rel (%p139_p2) target bundleno = 43 (0x2b), region = 32  ;;  %p163_p3 = scmp.lt.s32.totalorder (!%p139_p2), %s425_s14, 63 }
   0xb   : > { %s645_s14 = smov (!%p163_p3, %s425_s14), 63  ;;  %v562_v0 = vld [vmem:[%s640_s0] ss:$0 sm:$0xff] }
   0xc   : > { %s426_s15 = sshll.u32 %s645_s14, 3  ;;  %v572_v1 = vld [vmem:[%s641_s1] ss:$0 sm:$0xff]  ;;  %s428_s23 = sshll.u32 %s645_s14, 2 }
   0xd   : > { %s567_s20 = scalar_lea.vmem %s642_s2, %s426_s15  ;;  %s600_s26 = scalar_lea.vmem %s643_s3, %s428_s23 }
   0xe   : > { %v174_v2 = vld [vmem:[%s567_s20] sm:$0xff]  ;;  %v175_v3 = vld [vmem:[%s567_s20 + $0x8] sm:$0xff]  ;;  %v176_v4 = vld [vmem:[%s567_s20 + $0x10] sm:$0xff] }
   0xf   : > { %v197_v5 = vmul.f32 %v562_v0, %v174_v2  ;;  %v198_v6 = vmul.f32 %v562_v0, %v175_v3  ;;  %v177_v7 = vld [vmem:[%s567_s20 + $0x18] sm:$0xff]  ;;  %v199_v8 = vmul.f32 %v562_v0, %v176_v4  ;;  %v178_v9 = vld [vmem:[%s567_s20 + $0x20] sm:$0xff]  ;;  %v179_v10 = vld [vmem:[%s567_s20 + $0x28] sm:$0xff] }
  0x10   : > { %v200_v11 = vmul.f32 %v562_v0, %v177_v7  ;;  %v201_v12 = vmul.f32 %v562_v0, %v178_v9  ;;  %v202_v13 = vmul.f32 %v562_v0, %v179_v10  ;;  %v180_v14 = vld [vmem:[%s567_s20 + $0x30] sm:$0xff]  ;;  %v181_v15 = vld [vmem:[%s567_s20 + $0x38] sm:$0xff]  ;;  %v182_v30 = vld [vmem:[%s567_s20 + $0x40] sm:$0xff] }
  0x11   : > { %v220_v16 = vadd.f32 %v572_v1, %v197_v5  ;;  %v221_v17 = vadd.f32 %v572_v1, %v198_v6  ;;  %v222_v18 = vadd.f32 %v572_v1, %v199_v8  ;;  %v203_v19 = vmul.f32 %v562_v0, %v180_v14  ;;  %v183_v31 = vld [vmem:[%s567_s20 + $0x48] sm:$0xff]  ;;  %v184_v32 = vld [vmem:[%s567_s20 + $0x50] sm:$0xff]  ;;  %v185_v44 = vld [vmem:[%s567_s20 + $0x58] sm:$0xff] }
  0x12   : > { %v223_v20 = vadd.f32 %v572_v1, %v200_v11  ;;  %v224_v21 = vadd.f32 %v572_v1, %v201_v12  ;;  %v225_v22 = vadd.f32 %v572_v1, %v202_v13  ;;  %v204_v23 = vmul.f32 %v562_v0, %v181_v15  ;;  %v186_v46 = vld [vmem:[%s567_s20 + $0x60] sm:$0xff]  ;;  %v187_v56 = vld [vmem:[%s567_s20 + $0x68] sm:$0xff]  ;;  %v188_v60 = vld [vmem:[%s567_s20 + $0x70] sm:$0xff] }
  0x13   : > { %vm236_vm0 = vcmp.gt.f32.partialorder %v220_v16, 0.0  ;;  %vm237_vm1 = vcmp.gt.f32.partialorder %v221_v17, 0.0  ;;  %v252_v24 = vmul.f32 0.2, %v220_v16  ;;  %v253_v25 = vmul.f32 0.2, %v221_v17 }
  0x14   : > { %vm238_vm2 = vcmp.gt.f32.partialorder %v222_v18, 0.0  ;;  %vm239_vm3 = vcmp.gt.f32.partialorder %v223_v20, 0.0  ;;  %v254_v26 = vmul.f32 0.2, %v222_v18  ;;  %v255_v27 = vmul.f32 0.2, %v223_v20 }
  0x15   : > { %v268_v28 = vsel %vm236_vm0, %v220_v16, %v252_v24  ;;  %v269_v29 = vsel %vm237_vm1, %v221_v17, %v253_v25  ;;  %vm240_vm4 = vcmp.gt.f32.partialorder %v224_v21, 0.0  ;;  %vm241_vm5 = vcmp.gt.f32.partialorder %v225_v22, 0.0  ;;  %v189_v6 = vld [vmem:[%s567_s20 + $0x78] sm:$0xff] }
  0x16   : > { %v468_v33 = vpack.c.bf16 %v269_v29, %v268_v28  ;;  %v270_v34 = vsel %vm238_vm2, %v222_v18, %v254_v26  ;;  %v271_v35 = vsel %vm239_vm3, %v223_v20, %v255_v27  ;;  %v256_v36 = vmul.f32 0.2, %v224_v21 }
  0x17   : > { %v473_v37 = vpack.c.bf16 %v271_v35, %v270_v34  ;;  %v257_v38 = vmul.f32 0.2, %v225_v22  ;;  %v226_v39 = vadd.f32 %v572_v1, %v203_v19  ;;  %v227_v40 = vadd.f32 %v572_v1, %v204_v23 }
  0x18   : > { %469 = vst [vmem:[%s600_s26] sm:$0xff] %v468_v33   ;;  %v272_v41 = vsel %vm240_vm4, %v224_v21, %v256_v36  ;;  %v205_v42 = vmul.f32 %v562_v0, %v182_v30  ;;  %v206_v43 = vmul.f32 %v562_v0, %v183_v31  ;;  %v207_v45 = vmul.f32 %v562_v0, %v184_v32 }
  0x19   : > { %505 = vst [vmem:[%s600_s26 + $0x8] sm:$0xff] %v473_v37   ;;  %v273_v47 = vsel %vm241_vm5, %v225_v22, %v257_v38  ;;  %vm242_vm6 = vcmp.gt.f32.partialorder %v226_v39, 0.0  ;;  %vm243_vm7 = vcmp.gt.f32.partialorder %v227_v40, 0.0  ;;  %v258_v48 = vmul.f32 0.2, %v226_v39 }
  0x1a   : > { %v478_v49 = vpack.c.bf16 %v273_v47, %v272_v41  ;;  %v259_v50 = vmul.f32 0.2, %v227_v40  ;;  %v228_v51 = vadd.f32 %v572_v1, %v205_v42  ;;  %v229_v52 = vadd.f32 %v572_v1, %v206_v43 }
  0x1b   : > { %v274_v53 = vsel %vm242_vm6, %v226_v39, %v258_v48  ;;  %v208_v54 = vmul.f32 %v562_v0, %v185_v44  ;;  %v230_v55 = vadd.f32 %v572_v1, %v207_v45  ;;  %v209_v57 = vmul.f32 %v562_v0, %v186_v46 }
  0x1c   : > { %506 = vst [vmem:[%s600_s26 + $0x10] sm:$0xff] %v478_v49   ;;  %v275_v58 = vsel %vm243_vm7, %v227_v40, %v259_v50  ;;  %vm244_vm8 = vcmp.gt.f32.partialorder %v228_v51, 0.0  ;;  %vm245_vm9 = vcmp.gt.f32.partialorder %v229_v52, 0.0  ;;  %v260_v59 = vmul.f32 0.2, %v228_v51 }
  0x1d   : > { %v483_v61 = vpack.c.bf16 %v275_v58, %v274_v53  ;;  %v261_v62 = vmul.f32 0.2, %v229_v52  ;;  %v231_v63 = vadd.f32 %v572_v1, %v208_v54  ;;  %vm246_vm10 = vcmp.gt.f32.partialorder %v230_v55, 0.0 }
  0x1e   : > { %v276_v2 = vsel %vm244_vm8, %v228_v51, %v260_v59  ;;  %v262_v3 = vmul.f32 0.2, %v230_v55  ;;  %v210_v4 = vmul.f32 %v562_v0, %v187_v56  ;;  %v232_v5 = vadd.f32 %v572_v1, %v209_v57 }
  0x1f   : > { %507 = vst [vmem:[%s600_s26 + $0x18] sm:$0xff] %v483_v61   ;;  %v277_v7 = vsel %vm245_vm9, %v229_v52, %v261_v62  ;;  %vm247_vm11 = vcmp.gt.f32.partialorder %v231_v63, 0.0  ;;  %v263_v8 = vmul.f32 0.2, %v231_v63  ;;  %v211_v9 = vmul.f32 %v562_v0, %v188_v60 }
  0x20   : > { %v488_v10 = vpack.c.bf16 %v277_v7, %v276_v2  ;;  %v278_v11 = vsel %vm246_vm10, %v230_v55, %v262_v3  ;;  %v233_v12 = vadd.f32 %v572_v1, %v210_v4  ;;  %vm248_vm12 = vcmp.gt.f32.partialorder %v232_v5, 0.0 }
  0x21   : > { %v279_v13 = vsel %vm247_vm11, %v231_v63, %v263_v8  ;;  %v264_v14 = vmul.f32 0.2, %v232_v5  ;;  %v212_v15 = vmul.f32 %v562_v0, %v189_v6  ;;  %v234_v16 = vadd.f32 %v572_v1, %v211_v9 }
  0x22   : > { %508 = vst [vmem:[%s600_s26 + $0x20] sm:$0xff] %v488_v10   ;;  %v493_v17 = vpack.c.bf16 %v279_v13, %v278_v11  ;;  %vm249_vm13 = vcmp.gt.f32.partialorder %v233_v12, 0.0  ;;  %v265_v18 = vmul.f32 0.2, %v233_v12 }
  0x23   : > { %v280_v19 = vsel %vm248_vm12, %v232_v5, %v264_v14  ;;  %v235_v20 = vadd.f32 %v572_v1, %v212_v15  ;;  %vm250_vm14 = vcmp.gt.f32.partialorder %v234_v16, 0.0  ;;  %v266_v21 = vmul.f32 0.2, %v234_v16 }
  0x24   : > { %509 = vst [vmem:[%s600_s26 + $0x28] sm:$0xff] %v493_v17   ;;  %v281_v22 = vsel %vm249_vm13, %v233_v12, %v265_v18 }
  0x25   : > { %v498_v23 = vpack.c.bf16 %v281_v22, %v280_v19  ;;  %vm251_vm15 = vcmp.gt.f32.partialorder %v235_v20, 0.0  ;;  %v267_v24 = vmul.f32 0.2, %v235_v20  ;;  %v282_v25 = vsel %vm250_vm14, %v234_v16, %v266_v21 }
  0x27   : > { %510 = vst [vmem:[%s600_s26 + $0x30] sm:$0xff] %v498_v23   ;;  %v283_v0 = vsel %vm251_vm15, %v235_v20, %v267_v24 }
  0x28   : > { %v503_v26 = vpack.c.bf16 %v283_v0, %v282_v25 }
  0x2a   : > { %511 = vst [vmem:[%s600_s26 + $0x38] sm:$0xff] %v503_v26  }
  0x2b PF: > { %s13_s12 = sadd.s32 1, %s526_s12  }
  0x2c   : > { %p10_p4 = scmp.ge.s32.totalorder %s13_s12, 6  }
  0x2e   :  { %12 = sbr.rel (!%p10_p4) target bundleno = 1 (0x1), region = 62 }

// kernel: discriminator_forward.9
= control target key start
LH: loop header
LB: loop body
LE: loop exit
PB: predicated region body
PF: predicated region fallthrough
CT: control target
= control target key end

     0   :  { %s775_s1 = inlined_call_operand.vmem [shape: bf16[256,128], index: 1, kind: input, shape index: {}]   ;;  %s776_s0 = inlined_call_operand.vmem [shape: bf16[128,256], index: 0, kind: input, shape index: {}]   ;;  %s777_s2 = inlined_call_operand.vmem [shape: f32[128,128], index: 2, kind: output, shape index: {0}]   ;;  %s778_s3 = inlined_call_operand.vmem [shape: f32[1,8,128], index: 3, kind: output, shape index: {1}]   ;;  %s779_s4 = inlined_call_operand.vmem [shape: f32[1,8,128], index: 4, kind: output, shape index: {2}]  }
   0x1   :  { %v536_v0 = vld [vmem:[%s775_s1 + $0x78] sm:$0xff]   ;;  %v538_v2 = vld [vmem:[%s775_s1 + $0x70] sm:$0xff]   ;;  %v540_v4 = vld [vmem:[%s775_s1 + $0x68] sm:$0xff]  }
   0x2   :  { %v537_v1 = vld [vmem:[%s775_s1 + $0x38] sm:$0xff]   ;;  %456 = vmatprep.subr.bf16.mxu0 %v536_v0  ;;  %520 = vmatprep.subr.bf16.mxu1 %v536_v0  ;;  %v539_v3 = vld [vmem:[%s775_s1 + $0x30] sm:$0xff]   ;;  %v541_v5 = vld [vmem:[%s775_s1 + $0x28] sm:$0xff]  }
   0x3   :  { %457 = vmatpush3.bf16.msra.mxu0 %v537_v1  ;;  %528 = vmatpush3.bf16.msra.mxu1 %v537_v1  ;;  %v542_v6 = vld [vmem:[%s775_s1 + $0x60] sm:$0xff]   ;;  %v544_v8 = vld [vmem:[%s775_s1 + $0x58] sm:$0xff]   ;;  %v546_v10 = vld [vmem:[%s775_s1 + $0x50] sm:$0xff]  }
   0x4   :  { %458 = vmatprep.subr.bf16.mxu0 %v538_v2  ;;  %521 = vmatprep.subr.bf16.mxu1 %v538_v2  ;;  %v543_v7 = vld [vmem:[%s775_s1 + $0x20] sm:$0xff]   ;;  %v545_v9 = vld [vmem:[%s775_s1 + $0x18] sm:$0xff]   ;;  %v547_v12 = vld [vmem:[%s775_s1 + $0x10] sm:$0xff]  }
   0x5   :  { %v554_v11 = vld [vmem:[%s776_s0 + $0x4] ss:$8 sps:$4 sm:$0xff]   ;;  %v552_v18 = vld [vmem:[%s776_s0] ss:$8 sps:$4 sm:$0xff]   ;;  %v555_v20 = vld [vmem:[%s776_s0 + $0x14] ss:$8 sps:$4 sm:$0xff]  }
   0x6   :  { %v560_v13 = vld [vmem:[%s776_s0 + $0x44] ss:$8 sps:$4 sm:$0xff]   ;;  %271 = vmatprep.mubr.bf16.mxu0 %v554_v11  ;;  %v558_v19 = vld [vmem:[%s776_s0 + $0x40] ss:$8 sps:$4 sm:$0xff]   ;;  %v564_v21 = vld [vmem:[%s776_s0 + $0x54] ss:$8 sps:$4 sm:$0xff]  }
   0x7   :  { %459 = vmatpush3.bf16.msra.mxu0 %v539_v3  ;;  %529 = vmatpush3.bf16.msra.mxu1 %v539_v3  ;;  %v548_v14 = vld [vmem:[%s775_s1 + $0x48] sm:$0xff]   ;;  %v550_v16 = vld [vmem:[%s775_s1 + $0x40] sm:$0xff]   ;;  %v557_v22 = vld [vmem:[%s776_s0 + $0x10] ss:$8 sps:$4 sm:$0xff]  }
   0x8   :  { %460 = vmatprep.subr.bf16.mxu0 %v540_v4  ;;  %522 = vmatprep.subr.bf16.mxu1 %v540_v4  ;;  %v549_v15 = vld [vmem:[%s775_s1 + $0x8] sm:$0xff]   ;;  %v551_v17 = vld [vmem:[%s775_s1] sm:$0xff]   ;;  %v566_v23 = vld [vmem:[%s776_s0 + $0x50] ss:$8 sps:$4 sm:$0xff]  }
   0x9   :  { %303 = vmatprep.mubr.bf16.mxu1 %v560_v13  ;;  %v561_v24 = vld [vmem:[%s776_s0 + $0x24] ss:$8 sps:$4 sm:$0xff]   ;;  %v563_v26 = vld [vmem:[%s776_s0 + $0x20] ss:$8 sps:$4 sm:$0xff]   ;;  %v567_v28 = vld [vmem:[%s776_s0 + $0x34] ss:$8 sps:$4 sm:$0xff]  }
   0xa   :  { %v570_v25 = vld [vmem:[%s776_s0 + $0x64] ss:$8 sps:$4 sm:$0xff]   ;;  %v572_v27 = vld [vmem:[%s776_s0 + $0x60] ss:$8 sps:$4 sm:$0xff]   ;;  %v573_v29 = vld [vmem:[%s776_s0 + $0x74] ss:$8 sps:$4 sm:$0xff]  }
   0xb   :  { %461 = vmatpush3.bf16.msra.mxu0 %v541_v5  ;;  %530 = vmatpush3.bf16.msra.mxu1 %v541_v5  ;;  %v569_v30 = vld [vmem:[%s776_s0 + $0x30] ss:$8 sps:$4 sm:$0xff]  }
   0xc   :  { %462 = vmatprep.subr.bf16.mxu0 %v542_v6  ;;  %523 = vmatprep.subr.bf16.mxu1 %v542_v6  ;;  %v575_v31 = vld [vmem:[%s776_s0 + $0x70] ss:$8 sps:$4 sm:$0xff]  }
   0xf   :  { %463 = vmatpush3.bf16.msra.mxu0 %v543_v7  ;;  %531 = vmatpush3.bf16.msra.mxu1 %v543_v7 }
  0x10   :  { %464 = vmatprep.subr.bf16.mxu0 %v544_v8  ;;  %524 = vmatprep.subr.bf16.mxu1 %v544_v8 }
  0x13   :  { %465 = vmatpush3.bf16.msra.mxu0 %v545_v9  ;;  %532 = vmatpush3.bf16.msra.mxu1 %v545_v9 }
  0x14   :  { %466 = vmatprep.subr.bf16.mxu0 %v546_v10  ;;  %525 = vmatprep.subr.bf16.mxu1 %v546_v10 }
  0x17   :  { %467 = vmatpush3.bf16.msra.mxu0 %v547_v12  ;;  %533 = vmatpush3.bf16.msra.mxu1 %v547_v12 }
  0x18   :  { %468 = vmatprep.subr.bf16.mxu0 %v548_v14  ;;  %526 = vmatprep.subr.bf16.mxu1 %v548_v14 }
  0x1b   :  { %469 = vmatpush3.bf16.msra.mxu0 %v549_v15  ;;  %534 = vmatpush3.bf16.msra.mxu1 %v549_v15 }
  0x1c   :  { %470 = vmatprep.subr.bf16.mxu0 %v550_v16  ;;  %527 = vmatprep.subr.bf16.mxu1 %v550_v16 }
  0x1f   :  { %471 = vmatpush3.bf16.msra.mxu0 %v551_v17  ;;  %535 = vmatpush3.bf16.msra.mxu1 %v551_v17 }
  0x22   :  { %272 = vmatmul.mubr.bf16.vlgmr.msra.gmra.mxu0 %v552_v18  ;;  %304 = vmatmul.mubr.bf16.vlgmr.msra.gmra.mxu1 %v558_v19 }
  0x23   :  { %279 = vmatprep.mubr.bf16.mxu0 %v555_v20  ;;  %311 = vmatprep.mubr.bf16.mxu1 %v564_v21 }
  0x2a   :  { %280 = vmatmul.mubr.bf16.gmra.mxu0 %v557_v22  ;;  %312 = vmatmul.mubr.bf16.gmra.mxu1 %v566_v23 }
  0x2b   :  { %287 = vmatprep.mubr.bf16.mxu0 %v561_v24  ;;  %319 = vmatprep.mubr.bf16.mxu1 %v570_v25 }
  0x32   :  { %288 = vmatmul.mubr.bf16.gmra.mxu0 %v563_v26  ;;  %320 = vmatmul.mubr.bf16.gmra.mxu1 %v572_v27 }
  0x33   :  { %295 = vmatprep.mubr.bf16.mxu0 %v567_v28  ;;  %327 = vmatprep.mubr.bf16.mxu1 %v573_v29 }
  0x3a   :  { %296 = vmatmul.mubr.bf16.gmra.mxu0 %v569_v30  ;;  %328 = vmatmul.mubr.bf16.gmra.mxu1 %v575_v31 }
  0xe2   :  { %v472_v32 = vpop.f32.mrf.mxu0  ;;  %v496_v33 = vpop.f32.mrf.mxu1 }
  0xe4   :  { %v473_v34 = vpop.f32.mrf.mxu0  ;;  %v497_v35 = vpop.f32.mrf.mxu1 }
  0xe5   :  { %v474_v36 = vadd.f32 %v473_v34, %v472_v32  ;;  %v697_v37 = vadd.f32 %v497_v35, %v496_v33 }
  0xe6   :  { %v475_v38 = vpop.f32.mrf.mxu0  ;;  %v499_v39 = vpop.f32.mrf.mxu1 }
  0xe7   :  { %396 = vst [vmem:[%s777_s2] sm:$0xff] %v474_v36  ;;  %404 = vst [vmem:[%s777_s2 + $0x40] sm:$0xff] %v697_v37  ;;  %v357_v63 = vmul.f32 %v474_v36, %v474_v36 }
  0xe8   :  { %v476_v40 = vpop.f32.mrf.mxu0  ;;  %v500_v41 = vpop.f32.mrf.mxu1 }
  0xe9   :  { %v477_v42 = vadd.f32 %v476_v40, %v475_v38  ;;  %v706_v43 = vadd.f32 %v500_v41, %v499_v39  ;;  %v365_v38 = vmul.f32 %v697_v37, %v697_v37 }
  0xea   :  { %v478_v44 = vpop.f32.mrf.mxu0  ;;  %v502_v45 = vpop.f32.mrf.mxu1 }
  0xeb   :  { %397 = vst [vmem:[%s777_s2 + $0x8] sm:$0xff] %v477_v42  ;;  %405 = vst [vmem:[%s777_s2 + $0x48] sm:$0xff] %v706_v43  ;;  %v358_v58 = vmul.f32 %v477_v42, %v477_v42  ;;  %v336_v3 = vadd.f32 %v477_v42, %v474_v36  ;;  %v366_v41 = vmul.f32 %v706_v43, %v706_v43 }
  0xec   :  { %v479_v46 = vpop.f32.mrf.mxu0  ;;  %v503_v47 = vpop.f32.mrf.mxu1 }
  0xed   :  { %v480_v48 = vadd.f32 %v479_v46, %v478_v44  ;;  %v715_v49 = vadd.f32 %v503_v47, %v502_v45  ;;  %v373_v4 = vadd.f32 %v358_v58, %v357_v63 }
  0xee   :  { %v481_v50 = vpop.f32.mrf.mxu0  ;;  %v505_v51 = vpop.f32.mrf.mxu1 }
  0xef   :  { %398 = vst [vmem:[%s777_s2 + $0x10] sm:$0xff] %v480_v48  ;;  %406 = vst [vmem:[%s777_s2 + $0x50] sm:$0xff] %v715_v49  ;;  %v359_v0 = vmul.f32 %v480_v48, %v480_v48  ;;  %v337_v8 = vadd.f32 %v480_v48, %v336_v3  ;;  %v367_v45 = vmul.f32 %v715_v49, %v715_v49 }
  0xf0   :  { %v482_v52 = vpop.f32.mrf.mxu0  ;;  %v506_v53 = vpop.f32.mrf.mxu1 }
  0xf1   :  { %v483_v54 = vadd.f32 %v482_v52, %v481_v50  ;;  %v724_v55 = vadd.f32 %v506_v53, %v505_v51  ;;  %v374_v11 = vadd.f32 %v373_v4, %v359_v0 }
  0xf2   :  { %v484_v56 = vpop.f32.mrf.mxu0  ;;  %v508_v57 = vpop.f32.mrf.mxu1 }
  0xf3   :  { %399 = vst [vmem:[%s777_s2 + $0x18] sm:$0xff] %v483_v54  ;;  %407 = vst [vmem:[%s777_s2 + $0x58] sm:$0xff] %v724_v55  ;;  %v360_v5 = vmul.f32 %v483_v54, %v483_v54  ;;  %v338_v14 = vadd.f32 %v483_v54, %v337_v8  ;;  %v368_v48 = vmul.f32 %v724_v55, %v724_v55 }
  0xf4   :  { %v485_v59 = vpop.f32.mrf.mxu0  ;;  %v509_v60 = vpop.f32.mrf.mxu1 }
  0xf5   :  { %v486_v61 = vadd.f32 %v485_v59, %v484_v56  ;;  %v510_v62 = vadd.f32 %v509_v60, %v508_v57  ;;  %v375_v16 = vadd.f32 %v374_v11, %v360_v5 }
  0xf6   :  { %v487_v1 = vpop.f32.mrf.mxu0  ;;  %v511_v2 = vpop.f32.mrf.mxu1 }
  0xf7   :  { %400 = vst [vmem:[%s777_s2 + $0x20] sm:$0xff] %v486_v61  ;;  %408 = vst [vmem:[%s777_s2 + $0x60] sm:$0xff] %v510_v62  ;;  %v361_v15 = vmul.f32 %v486_v61, %v486_v61  ;;  %v339_v19 = vadd.f32 %v486_v61, %v338_v14 }
  0xf8   :  { %v488_v6 = vpop.f32.mrf.mxu0  ;;  %v512_v7 = vpop.f32.mrf.mxu1 }
  0xf9   :  { %v489_v9 = vadd.f32 %v488_v6, %v487_v1  ;;  %v513_v10 = vadd.f32 %v512_v7, %v511_v2  ;;  %v376_v25 = vadd.f32 %v375_v16, %v361_v15 }
  0xfa   :  { %v490_v12 = vpop.f32.mrf.mxu0  ;;  %v514_v13 = vpop.f32.mrf.mxu1 }
  0xfb   :  { %401 = vst [vmem:[%s777_s2 + $0x28] sm:$0xff] %v489_v9  ;;  %409 = vst [vmem:[%s777_s2 + $0x68] sm:$0xff] %v513_v10  ;;  %v362_v20 = vmul.f32 %v489_v9, %v489_v9  ;;  %v340_v26 = vadd.f32 %v489_v9, %v339_v19  ;;  %v370_v56 = vmul.f32 %v513_v10, %v513_v10 }
  0xfc   :  { %v491_v17 = vpop.f32.mrf.mxu0  ;;  %v515_v18 = vpop.f32.mrf.mxu1 }
  0xfd   :  { %v492_v21 = vadd.f32 %v491_v17, %v490_v12  ;;  %v516_v22 = vadd.f32 %v515_v18, %v514_v13  ;;  %v377_v30 = vadd.f32 %v376_v25, %v362_v20 }
  0xfe   :  { %v493_v23 = vpop.f32.mrf.mxu0  ;;  %v517_v24 = vpop.f32.mrf.mxu1 }
  0xff   :  { %v363_v27 = vmul.f32 %v492_v21, %v492_v21  ;;  %402 = vst [vmem:[%s777_s2 + $0x30] sm:$0xff] %v492_v21  ;;  %410 = vst [vmem:[%s777_s2 + $0x70] sm:$0xff] %v516_v22  ;;  %v341_v31 = vadd.f32 %v492_v21, %v340_v26  ;;  %v371_v59 = vmul.f32 %v516_v22, %v516_v22 }
 0x100   :  { %v494_v28 = vpop.f32.mrf.mxu0  ;;  %v518_v29 = vpop.f32.mrf.mxu1 }
 0x101   :  { %v495_v32 = vadd.f32 %v494_v28, %v493_v23  ;;  %v519_v33 = vadd.f32 %v518_v29, %v517_v24  ;;  %v378_v34 = vadd.f32 %v377_v30, %v363_v27 }
 0x103   :  { %v342_v35 = vadd.f32 %v495_v32, %v341_v31  ;;  %v364_v36 = vmul.f32 %v495_v32, %v495_v32  ;;  %403 = vst [vmem:[%s777_s2 + $0x38] sm:$0xff] %v495_v32  ;;  %411 = vst [vmem:[%s777_s2 + $0x78] sm:$0xff] %v519_v33  ;;  %v372_v63 = vmul.f32 %v519_v33, %v519_v33 }
 0x105   :  { %v343_v39 = vadd.f32 %v697_v37, %v342_v35  ;;  %v379_v40 = vadd.f32 %v378_v34, %v364_v36  ;;  %v369_v37 = vmul.f32 %v510_v62, %v510_v62 }
 0x107   :  { %v344_v42 = vadd.f32 %v706_v43, %v343_v39  ;;  %v380_v44 = vadd.f32 %v379_v40, %v365_v38 }
 0x109   :  { %v381_v46 = vadd.f32 %v380_v44, %v366_v41  ;;  %v345_v47 = vadd.f32 %v715_v49, %v344_v42 }
 0x10b   :  { %v346_v50 = vadd.f32 %v724_v55, %v345_v47  ;;  %v382_v51 = vadd.f32 %v381_v46, %v367_v45 }
 0x10d   :  { %v347_v52 = vadd.f32 %v510_v62, %v346_v50  ;;  %v383_v53 = vadd.f32 %v382_v51, %v368_v48 }
 0x10f   :  { %v348_v54 = vadd.f32 %v513_v10, %v347_v52  ;;  %v384_v57 = vadd.f32 %v383_v53, %v369_v37 }
 0x111   :  { %v385_v43 = vadd.f32 %v384_v57, %v370_v56  ;;  %v349_v58 = vadd.f32 %v516_v22, %v348_v54 }
 0x113   :  { %v386_v60 = vadd.f32 %v385_v43, %v371_v59  ;;  %v350_v61 = vadd.f32 %v519_v33, %v349_v58 }
 0x115   :  { %v351_v0 = vrot.slane %v350_v61, 4  ;;  %v387_v49 = vadd.f32 %v386_v60, %v372_v63 }
 0x117   :  { %v352_v1 = vadd.f32 %v351_v0, %v350_v61  ;;  %v388_v2 = vrot.slane %v387_v49, 4 }
 0x119   :  { %v353_v3 = vrot.slane %v352_v1, 2  ;;  %v389_v4 = vadd.f32 %v388_v2, %v387_v49 }
 0x11b   :  { %v354_v55 = vadd.f32 %v353_v3, %v352_v1  ;;  %v390_v5 = vrot.slane %v389_v4, 2 }
 0x11d   :  { %v355_v6 = vrot.slane %v354_v55, 1  ;;  %v391_v62 = vadd.f32 %v390_v5, %v389_v4 }
 0x11f   :  { %v356_v7 = vadd.f32 %v355_v6, %v354_v55  ;;  %v392_v8 = vrot.slane %v391_v62, 1 }
 0x121   :  { %v393_v9 = vadd.f32 %v392_v8, %v391_v62  ;;  %394 = vst [vmem:[%s778_s3] sm:$0xff] %v356_v7 }
 0x123   :  { %395 = vst [vmem:[%s779_s4] sm:$0xff] %v393_v9 }

// kernel: discriminator_forward.10
= control target key start
LH: loop header
LB: loop body
LE: loop exit
PB: predicated region body
PF: predicated region fallthrough
CT: control target
= control target key end

     0   :  { %s423_s0 = inlined_call_operand.vmem [shape: f32[1,128], index: 0, kind: input, shape index: {}]   ;;  %s424_s1 = inlined_call_operand.vmem [shape: f32[1,128], index: 1, kind: input, shape index: {}]   ;;  %s425_s2 = inlined_call_operand.vmem [shape: f32[128,128], index: 2, kind: input, shape index: {}]   ;;  %s426_s3 = inlined_call_operand.vmem [shape: bf16[128,128], index: 3, kind: output, shape index: {}]  }
   0x1   :  { %v14_v0 = vld [vmem:[%s425_s2] sm:$0xff]  ;;  %v15_v1 = vld [vmem:[%s425_s2 + $0x8] sm:$0xff]  ;;  %v16_v6 = vld [vmem:[%s425_s2 + $0x10] sm:$0xff] }
   0x2   :  { %v318_v2 = vld [vmem:[%s423_s0] ss:$0 sm:$0xff]  ;;  %v17_v7 = vld [vmem:[%s425_s2 + $0x18] sm:$0xff]  ;;  %v19_v11 = vld [vmem:[%s425_s2 + $0x28] sm:$0xff] }
   0x3   :  { %v37_v3 = vmul.f32 %v318_v2, %v14_v0  ;;  %v38_v4 = vmul.f32 %v318_v2, %v15_v1  ;;  %v325_v5 = vld [vmem:[%s424_s1] ss:$0 sm:$0xff]  ;;  %v39_v8 = vmul.f32 %v318_v2, %v16_v6  ;;  %v40_v9 = vmul.f32 %v318_v2, %v17_v7  ;;  %v20_v12 = vld [vmem:[%s425_s2 + $0x30] sm:$0xff]  ;;  %v21_v17 = vld [vmem:[%s425_s2 + $0x38] sm:$0xff] }
   0x4   :  { %v18_v10 = vld [vmem:[%s425_s2 + $0x20] sm:$0xff]  ;;  %v42_v16 = vmul.f32 %v318_v2, %v19_v11  ;;  %v43_v20 = vmul.f32 %v318_v2, %v20_v12  ;;  %v44_v21 = vmul.f32 %v318_v2, %v21_v17  ;;  %v23_v35 = vld [vmem:[%s425_s2 + $0x48] sm:$0xff]  ;;  %v24_v36 = vld [vmem:[%s425_s2 + $0x50] sm:$0xff] }
   0x5   :  { %v60_v13 = vadd.f32 %v325_v5, %v37_v3  ;;  %v61_v14 = vadd.f32 %v325_v5, %v38_v4  ;;  %v41_v15 = vmul.f32 %v318_v2, %v18_v10  ;;  %v62_v18 = vadd.f32 %v325_v5, %v39_v8  ;;  %v22_v34 = vld [vmem:[%s425_s2 + $0x40] sm:$0xff]  ;;  %v25_v42 = vld [vmem:[%s425_s2 + $0x58] sm:$0xff]  ;;  %v27_v48 = vld [vmem:[%s425_s2 + $0x68] sm:$0xff] }
   0x6   :  { %v63_v19 = vadd.f32 %v325_v5, %v40_v9  ;;  %v65_v29 = vadd.f32 %v325_v5, %v42_v16  ;;  %v66_v33 = vadd.f32 %v325_v5, %v43_v20  ;;  %v67_v40 = vadd.f32 %v325_v5, %v44_v21  ;;  %v26_v47 = vld [vmem:[%s425_s2 + $0x60] sm:$0xff]  ;;  %v28_v60 = vld [vmem:[%s425_s2 + $0x70] sm:$0xff]  ;;  %v29_v7 = vld [vmem:[%s425_s2 + $0x78] sm:$0xff] }
   0x7   :  { %vm76_vm0 = vcmp.gt.f32.partialorder %v60_v13, 0.0  ;;  %vm77_vm1 = vcmp.gt.f32.partialorder %v61_v14, 0.0  ;;  %v92_v22 = vmul.f32 0.2, %v60_v13  ;;  %v93_v23 = vmul.f32 0.2, %v61_v14 }
   0x8   :  { %vm78_vm2 = vcmp.gt.f32.partialorder %v62_v18, 0.0  ;;  %vm79_vm3 = vcmp.gt.f32.partialorder %v63_v19, 0.0  ;;  %v94_v24 = vmul.f32 0.2, %v62_v18  ;;  %v95_v25 = vmul.f32 0.2, %v63_v19 }
   0x9   :  { %v108_v26 = vsel %vm76_vm0, %v60_v13, %v92_v22  ;;  %v109_v27 = vsel %vm77_vm1, %v61_v14, %v93_v23  ;;  %v64_v28 = vadd.f32 %v325_v5, %v41_v15  ;;  %vm81_vm5 = vcmp.gt.f32.partialorder %v65_v29, 0.0 }
   0xa   :  { %v245_v30 = vpack.c.bf16 %v109_v27, %v108_v26  ;;  %v110_v31 = vsel %vm78_vm2, %v62_v18, %v94_v24  ;;  %v111_v32 = vsel %vm79_vm3, %v63_v19, %v95_v25  ;;  %v97_v39 = vmul.f32 0.2, %v65_v29 }
   0xb   :  { %v250_v37 = vpack.c.bf16 %v111_v32, %v110_v31  ;;  %vm80_vm4 = vcmp.gt.f32.partialorder %v64_v28, 0.0  ;;  %v96_v38 = vmul.f32 0.2, %v64_v28  ;;  %vm82_vm6 = vcmp.gt.f32.partialorder %v66_v33, 0.0 }
   0xc   :  { %246 = vst [vmem:[%s426_s3] sm:$0xff] %v245_v30   ;;  %v98_v41 = vmul.f32 0.2, %v66_v33  ;;  %v45_v44 = vmul.f32 %v318_v2, %v22_v34  ;;  %v46_v45 = vmul.f32 %v318_v2, %v23_v35  ;;  %v47_v46 = vmul.f32 %v318_v2, %v24_v36 }
   0xd   :  { %282 = vst [vmem:[%s426_s3 + $0x8] sm:$0xff] %v250_v37   ;;  %v112_v43 = vsel %vm80_vm4, %v64_v28, %v96_v38  ;;  %v113_v49 = vsel %vm81_vm5, %v65_v29, %v97_v39  ;;  %vm83_vm7 = vcmp.gt.f32.partialorder %v67_v40, 0.0  ;;  %v99_v50 = vmul.f32 0.2, %v67_v40 }
   0xe   :  { %v114_v51 = vsel %vm82_vm6, %v66_v33, %v98_v41  ;;  %v255_v52 = vpack.c.bf16 %v113_v49, %v112_v43  ;;  %v68_v53 = vadd.f32 %v325_v5, %v45_v44  ;;  %v69_v54 = vadd.f32 %v325_v5, %v46_v45 }
   0xf   :  { %v48_v55 = vmul.f32 %v318_v2, %v25_v42  ;;  %v115_v56 = vsel %vm83_vm7, %v67_v40, %v99_v50  ;;  %v70_v57 = vadd.f32 %v325_v5, %v47_v46  ;;  %v49_v58 = vmul.f32 %v318_v2, %v26_v47 }
  0x10   :  { %v50_v59 = vmul.f32 %v318_v2, %v27_v48  ;;  %283 = vst [vmem:[%s426_s3 + $0x10] sm:$0xff] %v255_v52   ;;  %v260_v61 = vpack.c.bf16 %v115_v56, %v114_v51  ;;  %vm84_vm8 = vcmp.gt.f32.partialorder %v68_v53, 0.0  ;;  %vm85_vm9 = vcmp.gt.f32.partialorder %v69_v54, 0.0 }
  0x11   :  { %v100_v62 = vmul.f32 0.2, %v68_v53  ;;  %v101_v63 = vmul.f32 0.2, %v69_v54  ;;  %v71_v0 = vadd.f32 %v325_v5, %v48_v55  ;;  %vm86_vm10 = vcmp.gt.f32.partialorder %v70_v57, 0.0 }
  0x12   :  { %v102_v1 = vmul.f32 0.2, %v70_v57  ;;  %284 = vst [vmem:[%s426_s3 + $0x18] sm:$0xff] %v260_v61   ;;  %v72_v4 = vadd.f32 %v325_v5, %v49_v58  ;;  %v73_v6 = vadd.f32 %v325_v5, %v50_v59  ;;  %v51_v8 = vmul.f32 %v318_v2, %v28_v60 }
  0x13   :  { %v116_v3 = vsel %vm84_vm8, %v68_v53, %v100_v62  ;;  %v117_v9 = vsel %vm85_vm9, %v69_v54, %v101_v63  ;;  %vm87_vm11 = vcmp.gt.f32.partialorder %v71_v0, 0.0  ;;  %v103_v10 = vmul.f32 0.2, %v71_v0 }
  0x14   :  { %v118_v11 = vsel %vm86_vm10, %v70_v57, %v102_v1  ;;  %v265_v12 = vpack.c.bf16 %v117_v9, %v116_v3  ;;  %vm88_vm12 = vcmp.gt.f32.partialorder %v72_v4, 0.0  ;;  %vm89_vm13 = vcmp.gt.f32.partialorder %v73_v6, 0.0 }
  0x15   :  { %v104_v13 = vmul.f32 0.2, %v72_v4  ;;  %v119_v14 = vsel %vm87_vm11, %v71_v0, %v103_v10  ;;  %v105_v15 = vmul.f32 0.2, %v73_v6  ;;  %v52_v16 = vmul.f32 %v318_v2, %v29_v7 }
  0x16   :  { %v74_v17 = vadd.f32 %v325_v5, %v51_v8  ;;  %285 = vst [vmem:[%s426_s3 + $0x20] sm:$0xff] %v265_v12   ;;  %v270_v18 = vpack.c.bf16 %v119_v14, %v118_v11 }
  0x17   :  { %v120_v19 = vsel %vm88_vm12, %v72_v4, %v104_v13  ;;  %v121_v20 = vsel %vm89_vm13, %v73_v6, %v105_v15  ;;  %v75_v21 = vadd.f32 %v325_v5, %v52_v16 }
  0x18   :  { %vm90_vm14 = vcmp.gt.f32.partialorder %v74_v17, 0.0  ;;  %v106_v22 = vmul.f32 0.2, %v74_v17  ;;  %286 = vst [vmem:[%s426_s3 + $0x28] sm:$0xff] %v270_v18   ;;  %v275_v23 = vpack.c.bf16 %v121_v20, %v120_v19 }
  0x19   :  { %vm91_vm15 = vcmp.gt.f32.partialorder %v75_v21, 0.0  ;;  %v107_v2 = vmul.f32 0.2, %v75_v21 }
  0x1a   :  { %v122_v24 = vsel %vm90_vm14, %v74_v17, %v106_v22  ;;  %287 = vst [vmem:[%s426_s3 + $0x30] sm:$0xff] %v275_v23  }
  0x1b   :  { %v123_v25 = vsel %vm91_vm15, %v75_v21, %v107_v2 }
  0x1c   :  { %v280_v26 = vpack.c.bf16 %v123_v25, %v122_v24 }
  0x1e   :  { %288 = vst [vmem:[%s426_s3 + $0x38] sm:$0xff] %v280_v26  }

// kernel: discriminator_forward.11
= control target key start
LH: loop header
LB: loop body
LE: loop exit
PB: predicated region body
PF: predicated region fallthrough
CT: control target
= control target key end

     0   :  { %vm526_vm4 = vcmask 0   ;;  %s847_s1 = inlined_call_operand.vmem [shape: bf16[512,128], index: 1, kind: input, shape index: {}]   ;;  %s848_s0 = inlined_call_operand.vmem [shape: bf16[32,512], index: 0, kind: input, shape index: {}]   ;;  %s849_s2 = inlined_call_operand.vmem [shape: f32[1,128], index: 2, kind: input, shape index: {}]   ;;  %s850_s3 = inlined_call_operand.vmem [shape: f32[1,128], index: 3, kind: input, shape index: {}]   ;;  %s851_s4 = inlined_call_operand.vmem [shape: f32[16,128], index: 4, kind: input, shape index: {}]   ;;  %s852_s5 = inlined_call_operand.vmem [shape: f32[2,1,1], index: 5, kind: output, shape index: {}]  }
   0x1   :  { %v629_v0 = vld [vmem:[%s847_s1 + $0x78] sm:$0xff]   ;;  %v633_v4 = vld [vmem:[%s847_s1 + $0x70] sm:$0xff]   ;;  %v637_v8 = vld [vmem:[%s847_s1 + $0x68] sm:$0xff]  }
   0x2   :  { %v630_v1 = vld [vmem:[%s847_s1 + $0xf8] sm:$0xff]   ;;  %573 = vmatprep.subr.bf16.mxu0 %v629_v0  ;;  %v634_v5 = vld [vmem:[%s847_s1 + $0xf0] sm:$0xff]   ;;  %v638_v9 = vld [vmem:[%s847_s1 + $0xe8] sm:$0xff]  }
   0x3   :  { %v631_v2 = vld [vmem:[%s847_s1 + $0x38] sm:$0xff]   ;;  %601 = vmatprep.subr.bf16.mxu1 %v630_v1  ;;  %v635_v6 = vld [vmem:[%s847_s1 + $0x30] sm:$0xff]   ;;  %v639_v10 = vld [vmem:[%s847_s1 + $0x28] sm:$0xff]  }
   0x4   :  { %v632_v3 = vld [vmem:[%s847_s1 + $0xb8] sm:$0xff]   ;;  %574 = vmatpush3.bf16.msra.mxu0 %v631_v2  ;;  %v636_v7 = vld [vmem:[%s847_s1 + $0xb0] sm:$0xff]   ;;  %v640_v11 = vld [vmem:[%s847_s1 + $0xa8] sm:$0xff]  }
   0x5   :  { %602 = vmatpush3.bf16.msra.mxu1 %v632_v3  ;;  %575 = vmatprep.subr.bf16.mxu0 %v633_v4  ;;  %v641_v12 = vld [vmem:[%s847_s1 + $0x60] sm:$0xff]   ;;  %v645_v16 = vld [vmem:[%s847_s1 + $0x58] sm:$0xff]   ;;  %v649_v20 = vld [vmem:[%s847_s1 + $0x50] sm:$0xff]  }
   0x6   :  { %603 = vmatprep.subr.bf16.mxu1 %v634_v5  ;;  %v642_v13 = vld [vmem:[%s847_s1 + $0xe0] sm:$0xff]   ;;  %v646_v17 = vld [vmem:[%s847_s1 + $0xd8] sm:$0xff]   ;;  %v650_v21 = vld [vmem:[%s847_s1 + $0xd0] sm:$0xff]  }
   0x7   :  { %v643_v14 = vld [vmem:[%s847_s1 + $0x20] sm:$0xff]   ;;  %v647_v18 = vld [vmem:[%s847_s1 + $0x18] sm:$0xff]   ;;  %v651_v22 = vld [vmem:[%s847_s1 + $0x10] sm:$0xff]  }
   0x8   :  { %576 = vmatpush3.bf16.msra.mxu0 %v635_v6  ;;  %v644_v15 = vld [vmem:[%s847_s1 + $0xa0] sm:$0xff]   ;;  %v648_v19 = vld [vmem:[%s847_s1 + $0x98] sm:$0xff]   ;;  %v652_v23 = vld [vmem:[%s847_s1 + $0x90] sm:$0xff]  }
   0x9   :  { %604 = vmatpush3.bf16.msra.mxu1 %v636_v7  ;;  %577 = vmatprep.subr.bf16.mxu0 %v637_v8  ;;  %v653_v24 = vld [vmem:[%s847_s1 + $0x48] sm:$0xff]   ;;  %v657_v28 = vld [vmem:[%s847_s1 + $0x40] sm:$0xff]  }
   0xa   :  { %605 = vmatprep.subr.bf16.mxu1 %v638_v9  ;;  %v654_v25 = vld [vmem:[%s847_s1 + $0xc8] sm:$0xff]   ;;  %v658_v29 = vld [vmem:[%s847_s1 + $0xc0] sm:$0xff]  }
   0xb   :  { %v655_v26 = vld [vmem:[%s847_s1 + $0x8] sm:$0xff]   ;;  %v659_v30 = vld [vmem:[%s847_s1] sm:$0xff]  }
   0xc   :  { %578 = vmatpush3.bf16.msra.mxu0 %v639_v10  ;;  %v656_v27 = vld [vmem:[%s847_s1 + $0x88] sm:$0xff]   ;;  %v660_v31 = vld [vmem:[%s847_s1 + $0x80] sm:$0xff]  }
   0xd   :  { %606 = vmatpush3.bf16.msra.mxu1 %v640_v11  ;;  %579 = vmatprep.subr.bf16.mxu0 %v641_v12  ;;  %v661_v32 = vld [vmem:[%s848_s0] ss:$16 sps:$4 sm:$0xff]   ;;  %v663_v33 = vld [vmem:[%s848_s0 + $0x4] ss:$16 sps:$4 sm:$0xff]   ;;  %v664_v34 = vld [vmem:[%s848_s0 + $0x8] ss:$16 sps:$4 sm:$0xff]  }
   0xe   :  { %607 = vmatprep.subr.bf16.mxu1 %v642_v13  ;;  %v666_v35 = vld [vmem:[%s848_s0 + $0xc] ss:$16 sps:$4 sm:$0xff]   ;;  %357 = vmatprep.mubr.bf16.mxu0 %v663_v33  ;;  %v667_v36 = vld [vmem:[%s848_s0 + $0x24] ss:$16 sps:$4 sm:$0xff]   ;;  %v671_v38 = vld [vmem:[%s848_s0 + $0x20] ss:$16 sps:$4 sm:$0xff]  }
   0xf   :  { %406 = vmatprep.mubr.bf16.mxu1 %v666_v35  ;;  %v669_v37 = vld [vmem:[%s848_s0 + $0x2c] ss:$16 sps:$4 sm:$0xff]   ;;  %v672_v39 = vld [vmem:[%s848_s0 + $0x28] ss:$16 sps:$4 sm:$0xff]  }
  0x10   :  { %580 = vmatpush3.bf16.msra.mxu0 %v643_v14 }
  0x11   :  { %608 = vmatpush3.bf16.msra.mxu1 %v644_v15  ;;  %581 = vmatprep.subr.bf16.mxu0 %v645_v16 }
  0x12   :  { %609 = vmatprep.subr.bf16.mxu1 %v646_v17 }
  0x14   :  { %582 = vmatpush3.bf16.msra.mxu0 %v647_v18 }
  0x15   :  { %610 = vmatpush3.bf16.msra.mxu1 %v648_v19  ;;  %583 = vmatprep.subr.bf16.mxu0 %v649_v20 }
  0x16   :  { %611 = vmatprep.subr.bf16.mxu1 %v650_v21 }
  0x18   :  { %584 = vmatpush3.bf16.msra.mxu0 %v651_v22 }
  0x19   :  { %612 = vmatpush3.bf16.msra.mxu1 %v652_v23  ;;  %585 = vmatprep.subr.bf16.mxu0 %v653_v24 }
  0x1a   :  { %613 = vmatprep.subr.bf16.mxu1 %v654_v25 }
  0x1c   :  { %586 = vmatpush3.bf16.msra.mxu0 %v655_v26 }
  0x1d   :  { %614 = vmatpush3.bf16.msra.mxu1 %v656_v27  ;;  %587 = vmatprep.subr.bf16.mxu0 %v657_v28 }
  0x1e   :  { %615 = vmatprep.subr.bf16.mxu1 %v658_v29 }
  0x20   :  { %588 = vmatpush3.bf16.msra.mxu0 %v659_v30 }
  0x21   :  { %616 = vmatpush3.bf16.msra.mxu1 %v660_v31 }
  0x23   :  { %358 = vmatmul.mubr.bf16.vlgmr.msra.gmra.mxu0 %v661_v32  ;;  %v459_v32 = vlaneseq }
  0x24   :  { %407 = vmatmul.mubr.bf16.vlgmr.msra.gmra.mxu1 %v664_v34  ;;  %365 = vmatprep.mubr.bf16.mxu0 %v667_v36  ;;  %v451_v34 = vld [vmem:[%s849_s2] sm:$0x1] }
  0x25   :  { %414 = vmatprep.mubr.bf16.mxu1 %v669_v37  ;;  %v460_v33 = vshrl.u32 %v459_v32, 7 }
  0x27   :  { %v461_v35 = vsub.s32 0, %v460_v33 }
  0x2b   :  { %366 = vmatmul.mubr.bf16.gmra.mxu0 %v671_v38  ;;  %v455_v38 = vld [vmem:[%s850_s3] sm:$0x1] }
  0x2c   :  { %415 = vmatmul.mubr.bf16.gmra.mxu1 %v672_v39 }
  0xe3   :  { %v589_v40 = vpop.f32.mrf.mxu0 }
  0xe4   :  { %v617_v41 = vpop.f32.mrf.mxu1 }
  0xe5   :  { %v590_v42 = vpop.f32.mrf.mxu0 }
  0xe6   :  { %v618_v43 = vpop.f32.mrf.mxu1  ;;  %v591_v49 = vadd.f32 %v590_v42, %v589_v40 }
  0xe7   :  { %v592_v44 = vpop.f32.mrf.mxu0  ;;  %v619_v50 = vadd.f32 %v618_v43, %v617_v41 }
  0xe8   :  { %v620_v45 = vpop.f32.mrf.mxu1 }
  0xe9   :  { %v593_v46 = vpop.f32.mrf.mxu0  ;;  %v409_v58 = vadd.f32 %v619_v50, %v591_v49 }
  0xea   :  { %v594_v47 = vadd.f32 %v593_v46, %v592_v44  ;;  %v621_v48 = vpop.f32.mrf.mxu1 }
  0xeb   :  { %v622_v51 = vadd.f32 %v621_v48, %v620_v45  ;;  %v595_v52 = vpop.f32.mrf.mxu0  ;;  %v434_v3 = vmul.f32 %v409_v58, %v409_v58 }
  0xec   :  { %v623_v53 = vpop.f32.mrf.mxu1 }
  0xed   :  { %v412_v54 = vadd.f32 %v622_v51, %v594_v47  ;;  %v596_v55 = vpop.f32.mrf.mxu0  ;;  %v490_v51 = vld [vmem:[%s851_s4] sm:$0xff] }
  0xee   :  { %v597_v56 = vadd.f32 %v596_v55, %v595_v52  ;;  %v624_v57 = vpop.f32.mrf.mxu1 }
  0xef   :  { %v625_v59 = vadd.f32 %v624_v57, %v623_v53  ;;  %v598_v60 = vpop.f32.mrf.mxu0  ;;  %v435_v62 = vmul.f32 %v412_v54, %v412_v54  ;;  %v423_v4 = vadd.f32 %v412_v54, %v409_v58 }
  0xf0   :  { %v626_v61 = vpop.f32.mrf.mxu1 }
  0xf1   :  { %v417_v63 = vadd.f32 %v625_v59, %v597_v56  ;;  %v599_v0 = vpop.f32.mrf.mxu0  ;;  %v438_v7 = vadd.f32 %v435_v62, %v434_v3 }
  0xf2   :  { %v600_v1 = vadd.f32 %v599_v0, %v598_v60  ;;  %v627_v2 = vpop.f32.mrf.mxu1 }
  0xf3   :  { %v436_v5 = vmul.f32 %v417_v63, %v417_v63  ;;  %v628_v6 = vadd.f32 %v627_v2, %v626_v61  ;;  %v424_v8 = vadd.f32 %v423_v4, %v417_v63  ;;  %v491_v61 = vld [vmem:[%s851_s4 + $0x8] sm:$0xff] }
  0xf5   :  { %v420_v9 = vadd.f32 %v628_v6, %v600_v1  ;;  %v439_v10 = vadd.f32 %v438_v7, %v436_v5 }
  0xf7   :  { %v425_v11 = vadd.f32 %v424_v8, %v420_v9  ;;  %v437_v12 = vmul.f32 %v420_v9, %v420_v9 }
  0xf9   :  { %v426_v13 = vrot.slane %v425_v11, 4  ;;  %v440_v14 = vadd.f32 %v439_v10, %v437_v12 }
  0xfb   :  { %v427_v15 = vadd.f32 %v426_v13, %v425_v11  ;;  %v441_v16 = vrot.slane %v440_v14, 4 }
  0xfd   :  { %v428_v17 = vrot.slane %v427_v15, 2  ;;  %v442_v18 = vadd.f32 %v441_v16, %v440_v14 }
  0xff   :  { %v429_v19 = vadd.f32 %v428_v17, %v427_v15  ;;  %v443_v20 = vrot.slane %v442_v18, 2 }
 0x101   :  { %v430_v21 = vrot.slane %v429_v19, 1  ;;  %v444_v22 = vadd.f32 %v443_v20, %v442_v18 }
 0x103   :  { %v431_v23 = vadd.f32 %v430_v21, %v429_v19  ;;  %v445_v24 = vrot.slane %v444_v22, 1 }
 0x105   :  { %v433_v25 = vmul.f32 0.03125, %v431_v23  ;;  %v446_v26 = vadd.f32 %v445_v24, %v444_v22 }
 0x107   :  { %v447_v27 = vmul.f32 0.03125, %v446_v26  ;;  %v448_v28 = vmul.f32 %v433_v25, %v433_v25 }
 0x109   :  { %v449_v29 = vsub.f32 %v447_v27, %v448_v28 }
 0x10b   :  { %v450_v30 = vmax.f32 %v449_v29, 0.0 }
 0x10d   :  { %v452_v31 = vadd.f32 1e-05, %v450_v30 }
 0x10f   :  { %673 = vrsqrt.f32 %v452_v31 }
 0x11c   :  { %v674_v36 = vpop.eup %673 }
 0x11d   :  { %v454_v37 = vmul.f32 %v674_v36, %v451_v34 }
 0x11f   :  { %v456_v39 = vmul.f32 %v454_v37, %v433_v25  ;;  %v462_v40 = vrot.slane %v454_v37, %v461_v35 }
 0x121   :  { %v457_v41 = vsub.f32 %v455_v38, %v456_v39  ;;  %v467_v42 = vmul.f32 %v462_v40, %v420_v9  ;;  %v466_v43 = vmul.f32 %v462_v40, %v417_v63  ;;  %v464_v45 = vmul.f32 %v462_v40, %v409_v58 }
 0x122   :  { %v465_v46 = vmul.f32 %v462_v40, %v412_v54 }
 0x123   :  { %v472_v44 = vrot.slane %v457_v41, %v461_v35 }
 0x125   :  { %v476_v47 = vadd.f32 %v472_v44, %v466_v43  ;;  %v474_v48 = vadd.f32 %v472_v44, %v464_v45  ;;  %v477_v49 = vadd.f32 %v472_v44, %v467_v42  ;;  %v475_v50 = vadd.f32 %v472_v44, %v465_v46 }
 0x127   :  { %vm480_vm0 = vcmp.gt.f32.partialorder %v476_v47, 0.0  ;;  %v484_v52 = vmul.f32 0.2, %v476_v47  ;;  %vm478_vm1 = vcmp.gt.f32.partialorder %v474_v48, 0.0  ;;  %v482_v53 = vmul.f32 0.2, %v474_v48 }
 0x128   :  { %vm481_vm2 = vcmp.gt.f32.partialorder %v477_v49, 0.0  ;;  %v485_v55 = vmul.f32 0.2, %v477_v49  ;;  %vm479_vm3 = vcmp.gt.f32.partialorder %v475_v50, 0.0  ;;  %v483_v56 = vmul.f32 0.2, %v475_v50 }
 0x129   :  { %v488_v57 = vsel %vm480_vm0, %v476_v47, %v484_v52  ;;  %v486_v59 = vsel %vm478_vm1, %v474_v48, %v482_v53 }
 0x12a   :  { %v494_v58 = vmul.f32 %v490_v51, %v488_v57  ;;  %v492_v54 = vmul.f32 %v490_v51, %v486_v59  ;;  %v489_v60 = vsel %vm481_vm2, %v477_v49, %v485_v55  ;;  %v487_v62 = vsel %vm479_vm3, %v475_v50, %v483_v56 }
 0x12b   :  { %v495_v63 = vmul.f32 %v491_v61, %v489_v60  ;;  %v493_v0 = vmul.f32 %v491_v61, %v487_v62 }
 0x12c   :  { %500 = vadd.xlane.f32.xlu1 %v494_v58  ;;  %496 = vadd.xlane.f32.xlu0 %v492_v54 }
 0x130   :  { %502 = vadd.xlane.f32.xlu1 %v495_v63  ;;  %498 = vadd.xlane.f32.xlu0 %v493_v0 }
 0x1b5   :  { %v501_v1 = vpop.xlane.xlu1 %500  ;;  %v497_v2 = vpop.xlane.xlu0 %496 }
 0x1b9   :  { %v503_v3 = vpop.xlane.xlu1 %502  ;;  %v499_v4 = vpop.xlane.xlu0 %498 }
 0x1ba   :  { %v511_v5 = vadd.f32 %v503_v3, %v501_v1  ;;  %v504_v6 = vadd.f32 %v499_v4, %v497_v2 }
 0x1bc   :  { %v512_v7 = vrot.slane %v511_v5, 4  ;;  %v505_v8 = vrot.slane %v504_v6, 4 }
 0x1be   :  { %v513_v9 = vadd.f32 %v512_v7, %v511_v5  ;;  %v506_v10 = vadd.f32 %v505_v8, %v504_v6 }
 0x1c0   :  { %v514_v11 = vrot.slane %v513_v9, 2  ;;  %v507_v12 = vrot.slane %v506_v10, 2 }
 0x1c2   :  { %v515_v13 = vadd.f32 %v514_v11, %v513_v9  ;;  %v508_v14 = vadd.f32 %v507_v12, %v506_v10 }
 0x1c4   :  { %v516_v15 = vrot.slane %v515_v13, 1  ;;  %v509_v16 = vrot.slane %v508_v14, 1 }
 0x1c6   :  { %v517_v17 = vadd.f32 %v516_v15, %v515_v13  ;;  %v510_v18 = vadd.f32 %v509_v16, %v508_v14 }
 0x1c8   :  { %v519_v19 = vmul.f32 0.5, %v517_v17  ;;  %v518_v20 = vmul.f32 0.5, %v510_v18 }
 0x1ca   :  { %675 = vtanh.f32 %v519_v19 }
 0x1cb   :  { %677 = vtanh.f32 %v518_v20 }
 0x1d7   :  { %v676_v21 = vpop.eup %675 }
 0x1d8   :  { %v678_v22 = vpop.eup %677  ;;  %v523_v23 = vadd.f32 1.0, %v676_v21 }
 0x1d9   :  { %v522_v24 = vadd.f32 1.0, %v678_v22 }
 0x1da   :  { %v525_v25 = vmul.f32 0.5, %v523_v23 }
 0x1db   :  { %v524_v26 = vmul.f32 0.5, %v522_v24 }
 0x1dc   :  { %528 = vst.msk [vmem:[%s852_s5 + $0x1] sm:$0x1] %vm526_vm4, %v525_v25 }
 0x1dd   :  { %527 = vst.msk [vmem:[%s852_s5] sm:$0x1] %vm526_vm4, %v524_v26 }

</bundles_post_ra>
